<compile_context>
chip_gen: v5e
topology: v5e:2x2
jax: 0.10.0
libtpu: 0.0.40
codegen_flags: <defaults>
</compile_context>

<pallas_src>
import jax
import jax.numpy as jnp
from jax.experimental import pallas as pl
from jax.experimental.pallas import tpu as pltpu

BN_EPS = 1e-5


def _vmem_limit_bytes():
    # v5e/v6e: 128 MiB physical VMEM -> ~96 MiB scoped budget; v7x: 64 -> 48 MiB.
    try:
        info = pltpu.get_tpu_info()
        phys = int(getattr(info, "vmem_capacity_bytes", 0) or 0)
        if phys > 0:
            return int(min(phys * 3 // 4, 110 * 1024 * 1024))
    except Exception:
        pass
    return 48 * 1024 * 1024


_VMEM_LIMIT = _vmem_limit_bytes()


# ----------------------------------------------------------------------------
# Shared in-kernel helpers.
# ----------------------------------------------------------------------------
def _width_im2col(x, W2):
    """(H2, W2, C) -> (H2, W2, 3*C): W taps dj=0,1,2 folded into the lane/K dim."""
    C = x.shape[-1]
    zcol = jnp.zeros((x.shape[0], 1, C), x.dtype)
    sh_l = jnp.concatenate([zcol, x[:, :W2 - 1, :]], axis=1)   # dj=0 (reads j-1)
    sh_r = jnp.concatenate([x[:, 1:, :], zcol], axis=1)        # dj=2 (reads j+1)
    return jnp.concatenate([sh_l, x, sh_r], axis=-1)


def _conv3_rows(pad_ref, w_ref, H2, W2):
    """3x3 conv as 3 accumulated MXU matmuls (one per kernel row di), K = 3*Cin.

    pad_ref: (H2+2, W2, 3*Cin) bf16 width-im2col scratch (rows 0 / H2+1 are zero).
    w_ref:   (3, 3*Cin, Cout) bf16.
    Returns: (H2*W2, Cout) f32 accumulator.
    """
    K3 = pad_ref.shape[-1]
    Cout = w_ref.shape[-1]
    acc = jnp.zeros((H2 * W2, Cout), jnp.float32)
    for di in range(3):                              # unrolled: 3 MXU pushes
        rows = pad_ref[di:di + H2]                   # free leading-dim slice
        acc = acc + jnp.dot(rows.reshape(H2 * W2, K3), w_ref[di],
                            preferred_element_type=jnp.float32)
    return acc


# ----------------------------------------------------------------------------
# Kernel 1: conv1 (width-im2col, 3 matmuls) + BN1 batch-stat accumulation.
# Input is already 2x2-maxpooled and bf16 (done in the wrapper).
# ----------------------------------------------------------------------------
def _conv1_kernel(x_ref, w_ref, y_ref, sum_ref, sq_ref, pad_ref):
    b = pl.program_id(1)
    Hp, W2, K3 = pad_ref.shape
    H2 = Hp - 2

    @pl.when(b == 0)
    def _():
        # Halo rows (H padding) are never written afterwards; zero once per core.
        pad_ref[0] = jnp.zeros((W2, K3), pad_ref.dtype)
        pad_ref[Hp - 1] = jnp.zeros((W2, K3), pad_ref.dtype)
        sum_ref[...] = jnp.zeros_like(sum_ref)
        sq_ref[...] = jnp.zeros_like(sq_ref)

    # Interior rows: aligned leading-dim store of the width-im2col tile.
    pad_ref[1:H2 + 1] = _width_im2col(x_ref[0], W2)

    acc = _conv3_rows(pad_ref, w_ref, H2, W2)        # (H2*W2, Cmid) f32
    y_ref[0] = acc.astype(y_ref.dtype)               # bf16 intermediate -> HBM
    # BN1 batch statistics from the f32 accumulator (before the bf16 rounding).
    sum_ref[...] += jnp.sum(acc, axis=0).reshape(1, 1, -1)
    sq_ref[...] += jnp.sum(acc * acc, axis=0).reshape(1, 1, -1)


# ----------------------------------------------------------------------------
# Kernel 2: fused BN1 scale/shift + ReLU -> conv2 + BN2 batch-stat accumulation.
# ----------------------------------------------------------------------------
def _bn_relu_conv2_kernel(y1_ref, scale_ref, shift_ref, w_ref,
                          y_ref, sum_ref, sq_ref, pad_ref):
    b = pl.program_id(1)
    Hp, W2, K3 = pad_ref.shape
    H2 = Hp - 2
    C = K3 // 3

    @pl.when(b == 0)
    def _():
        pad_ref[0] = jnp.zeros((W2, K3), pad_ref.dtype)
        pad_ref[Hp - 1] = jnp.zeros((W2, K3), pad_ref.dtype)
        sum_ref[...] = jnp.zeros_like(sum_ref)
        sq_ref[...] = jnp.zeros_like(sq_ref)

    # BN1 (pre-folded per-channel scale/shift) + ReLU in f32, bf16 for the MXU.
    a1 = jnp.maximum(y1_ref[0].astype(jnp.float32) * scale_ref[0] + shift_ref[0],
                     0.0)                                      # (H2*W2, Cmid)
    a1 = a1.reshape(H2, W2, C).astype(pad_ref.dtype)

    pad_ref[1:H2 + 1] = _width_im2col(a1, W2)

    acc = _conv3_rows(pad_ref, w_ref, H2, W2)        # (H2*W2, Cout) f32
    y_ref[0] = acc.astype(y_ref.dtype)
    sum_ref[...] += jnp.sum(acc, axis=0).reshape(1, 1, -1)
    sq_ref[...] += jnp.sum(acc * acc, axis=0).reshape(1, 1, -1)


# ----------------------------------------------------------------------------
# JAX glue: fold global batch stats + affine into per-channel scale/shift.
# ----------------------------------------------------------------------------
def _fold_bn(sums, sumsqs, gamma, beta, count):
    mean = jnp.sum(sums, axis=(0, 1)) / count                    # (C,)
    var = jnp.maximum(jnp.sum(sumsqs, axis=(0, 1)) / count - mean * mean, 0.0)
    scale = gamma * jax.lax.rsqrt(var + BN_EPS)
    shift = beta - mean * scale
    return scale.reshape(1, -1), shift.reshape(1, -1)


# ----------------------------------------------------------------------------
# Down module forward.
# ----------------------------------------------------------------------------
@jax.jit
def down_forward(x_nchw, params):
    w1, w2 = params["w1"], params["w2"]
    g1, b1 = params["gamma1"], params["beta1"]
    g2, b2 = params["gamma2"], params["beta2"]

    B, Cin, H, W = x_nchw.shape
    H2, W2 = H // 2, W // 2
    Cmid, Cout = w1.shape[-1], w2.shape[-1]
    Mi = H2 * W2
    M = B * Mi                      # rows BatchNorm reduces over (N*H*W)

    # Leading "parallel" grid axis of size NC: v7x / megacore chips split the
    # batch across TensorCores (per-core partial BN stats, no race); on
    # single-core chips it simply runs serially.
    NC = 2 if (B % 2 == 0 and B >= 2) else 1
    Bp = B // NC

    # Weights: fold the dj taps into K (K = 3*C) and cast once to bf16 (HWIO
    # (3,3,Ci,Co) -> (3, 3*Ci, Co), row-major so [di, dj*Ci+ci, co] = w[di,dj,ci,co]).
    w1r = w1.reshape(3, 3 * Cin, Cmid).astype(jnp.bfloat16)
    w2r = w2.reshape(3, 3 * Cmid, Cout).astype(jnp.bfloat16)

    # NCHW -> NHWC, full 2x2 MaxPool and bf16 cast in one fused XLA pass.
    x_nhwc = jnp.transpose(x_nchw, (0, 2, 3, 1))
    xp = jnp.maximum(
        jnp.maximum(x_nhwc[:, 0::2, 0::2, :], x_nhwc[:, 0::2, 1::2, :]),
        jnp.maximum(x_nhwc[:, 1::2, 0::2, :], x_nhwc[:, 1::2, 1::2, :]),
    ).astype(jnp.bfloat16)                                    # (B, H2, W2, Cin)

    # ---- kernel 1: conv1 + BN1 stats ------------------------------------------
    y1_raw, sum1, sq1 = pl.pallas_call(
        _conv1_kernel,
        grid_spec=pltpu.PrefetchScalarGridSpec(
            num_scalar_prefetch=0,
            grid=(NC, Bp),
            in_specs=[
                pl.BlockSpec((1, H2, W2, Cin), lambda c, b: (c * Bp + b, 0, 0, 0)),
                pl.BlockSpec((3, 3 * Cin, Cmid), lambda c, b: (0, 0, 0)),
            ],
            out_specs=[
                pl.BlockSpec((1, Mi, Cmid), lambda c, b: (c * Bp + b, 0, 0)),
                pl.BlockSpec((1, 1, Cmid), lambda c, b: (c, 0, 0)),  # per-core stats
                pl.BlockSpec((1, 1, Cmid), lambda c, b: (c, 0, 0)),
            ],
            scratch_shapes=[pltpu.VMEM((H2 + 2, W2, 3 * Cin), jnp.bfloat16)],
        ),
        out_shape=(jax.ShapeDtypeStruct((B, Mi, Cmid), jnp.bfloat16),
                   jax.ShapeDtypeStruct((NC, 1, Cmid), jnp.float32),
                   jax.ShapeDtypeStruct((NC, 1, Cmid), jnp.float32)),
        compiler_params=pltpu.CompilerParams(
            dimension_semantics=("parallel", "arbitrary"),
            vmem_limit_bytes=_VMEM_LIMIT),
        cost_estimate=pl.CostEstimate(
            flops=2 * M * 9 * Cin * Cmid,
            transcendentals=0,
            bytes_accessed=xp.size * 2 + w1r.size * 2 + M * Cmid * 2),
    )(xp, w1r)

    scale1, shift1 = _fold_bn(sum1, sq1, g1, b1, M)

    # ---- kernel 2: BN1+ReLU fused into conv2 + BN2 stats ----------------------
    y2_raw, sum2, sq2 = pl.pallas_call(
        _bn_relu_conv2_kernel,
        grid_spec=pltpu.PrefetchScalarGridSpec(
            num_scalar_prefetch=0,
            grid=(NC, Bp),
            in_specs=[
                pl.BlockSpec((1, Mi, Cmid), lambda c, b: (c * Bp + b, 0, 0)),
                pl.BlockSpec((1, Cmid), lambda c, b: (0, 0)),
                pl.BlockSpec((1, Cmid), lambda c, b: (0, 0)),
                pl.BlockSpec((3, 3 * Cmid, Cout), lambda c, b: (0, 0, 0)),
            ],
            out_specs=[
                pl.BlockSpec((1, Mi, Cout), lambda c, b: (c * Bp + b, 0, 0)),
                pl.BlockSpec((1, 1, Cout), lambda c, b: (c, 0, 0)),
                pl.BlockSpec((1, 1, Cout), lambda c, b: (c, 0, 0)),
            ],
            scratch_shapes=[pltpu.VMEM((H2 + 2, W2, 3 * Cmid), jnp.bfloat16)],
        ),
        out_shape=(jax.ShapeDtypeStruct((B, Mi, Cout), jnp.bfloat16),
                   jax.ShapeDtypeStruct((NC, 1, Cout), jnp.float32),
                   jax.ShapeDtypeStruct((NC, 1, Cout), jnp.float32)),
        compiler_params=pltpu.CompilerParams(
            dimension_semantics=("parallel", "arbitrary"),
            vmem_limit_bytes=_VMEM_LIMIT),
        cost_estimate=pl.CostEstimate(
            flops=2 * M * 9 * Cmid * Cout,
            transcendentals=0,
            bytes_accessed=M * Cmid * 2 + w2r.size * 2 + M * Cout * 2),
    )(y1_raw, scale1, shift1, w2r)

    scale2, shift2 = _fold_bn(sum2, sq2, g2, b2, M)

    # BN2 + ReLU as plain jnp: XLA fuses it with the NHWC->NCHW relayout, so
    # y2_raw makes exactly one more HBM round trip (the old kernel 3 is gone).
    y2 = jnp.maximum(y2_raw.astype(jnp.float32) * scale2 + shift2, 0.0)
    y2 = y2.reshape(B, H2, W2, Cout)
    return jnp.transpose(y2, (0, 3, 1, 2))            # NHWC -> NCHW


def init_params(key, in_channels, out_channels):
    mid_channels = out_channels
    k1, k2 = jax.random.split(key)
    # Weights in HWIO layout: (3, 3, Cin, Cout).
    w1 = 0.1 * jax.random.normal(k1, (3, 3, in_channels, mid_channels), jnp.float32)
    w2 = 0.1 * jax.random.normal(k2, (3, 3, mid_channels, out_channels), jnp.float32)
    return {
        "w1": w1, "gamma1": jnp.ones((mid_channels,), jnp.float32),
        "beta1": jnp.zeros((mid_channels,), jnp.float32),
        "w2": w2, "gamma2": jnp.ones((out_channels,), jnp.float32),
        "beta2": jnp.zeros((out_channels,), jnp.float32),
    }


# Pure-JAX reference (same math; mirrors the kernel's bf16 MXU operands with
# f32 accumulation / f32 BatchNorm) for the in-script correctness check.
def down_forward_ref(x_nchw, params):
    x = jnp.transpose(x_nchw, (0, 2, 3, 1))
    x = jax.lax.reduce_window(x, -jnp.inf, jax.lax.max,
                              (1, 2, 2, 1), (1, 2, 2, 1), "VALID")

    def conv_bn_relu(x, w, gamma, beta):
        y = jax.lax.conv_general_dilated(
            x.astype(jnp.bfloat16), w.astype(jnp.bfloat16), (1, 1), "SAME",
            dimension_numbers=("NHWC", "HWIO", "NHWC"),
            preferred_element_type=jnp.float32)
        mean = jnp.mean(y, axis=(0, 1, 2), keepdims=True)
        var = jnp.mean((y - mean) ** 2, axis=(0, 1, 2), keepdims=True)
        y = (y - mean) * jax.lax.rsqrt(var + BN_EPS) * gamma + beta
        return jnp.maximum(y, 0.0)

    x = conv_bn_relu(x, params["w1"], params["gamma1"], params["beta1"])
    x = conv_bn_relu(x, params["w2"], params["gamma2"], params["beta2"])
    return jnp.transpose(x, (0, 3, 1, 2))


if __name__ == "__main__":
    key = jax.random.PRNGKey(0)
    kx, kp = jax.random.split(key)

    B, Cin, H, W = 2, 4, 16, 16
    Cout = 8
    x = jax.random.normal(kx, (B, Cin, H, W), jnp.float32)
    params = init_params(kp, Cin, Cout)

    y = down_forward(x, params)
    jax.block_until_ready(y)
    assert y.shape == (B, Cout, H // 2, W // 2), y.shape

    y_ref = down_forward_ref(x, params)
    max_err = float(jnp.max(jnp.abs(y - y_ref)))
    assert jnp.allclose(y, y_ref, rtol=2e-2, atol=2e-2), max_err

    print("KERNEL_OK")
</pallas_src>

<mosaic_0001>
module attributes {stable_mosaic.version = 11 : i64} {
  func.func @_conv1_kernel(%arg0: i32, %arg1: i32, %arg2: memref<1x8x8x4xbf16, #tpu.memory_space<vmem>>, %arg3: memref<3x12x8xbf16, #tpu.memory_space<vmem>>, %arg4: memref<1x64x8xbf16, #tpu.memory_space<vmem>>, %arg5: memref<1x1x8xf32, #tpu.memory_space<vmem>>, %arg6: memref<1x1x8xf32, #tpu.memory_space<vmem>>, %arg7: memref<10x8x12xbf16, #tpu.memory_space<vmem>>) attributes {dimension_semantics = [#tpu.dimension_semantics<parallel>, #tpu.dimension_semantics<arbitrary>], iteration_bounds = array<i64: 2, 1>, scalar_prefetch = 0 : i64, scratch_operands = 1 : i64, tpu.core_type = #tpu.core_type<tc>, window_params = [{transform_indices = @transform_0, window_bounds = array<i64: 1, 8, 8, 4>}, {pipeline_mode = #tpu.pipeline_mode<synchronous>, transform_indices = @transform_1, window_bounds = array<i64: 3, 12, 8>}, {transform_indices = @transform_2, window_bounds = array<i64: 1, 64, 8>}, {transform_indices = @transform_3, window_bounds = array<i64: 1, 1, 8>}, {transform_indices = @transform_4, window_bounds = array<i64: 1, 1, 8>}]} {
    %c0_i32 = arith.constant 0 : i32
    %0 = arith.cmpi eq, %arg1, %c0_i32 : i32
    %1 = arith.extui %0 : i1 to i32
    %c0_i32_0 = arith.constant 0 : i32
    %2 = arith.cmpi ne, %1, %c0_i32_0 : i32
    scf.if %2 {
      %cst_44 = arith.constant 0.000000e+00 : bf16
      %46 = vector.broadcast %cst_44 : bf16 to vector<8x12xbf16>
      %c0_45 = arith.constant 0 : index
      %c0_46 = arith.constant 0 : index
      %c0_47 = arith.constant 0 : index
      %47 = vector.load %arg7[%c0_45, %c0_46, %c0_47] : memref<10x8x12xbf16, #tpu.memory_space<vmem>>, vector<1x8x12xbf16>
      %48 = vector.shape_cast %47 : vector<1x8x12xbf16> to vector<8x12xbf16>
      %49 = vector.shape_cast %46 : vector<8x12xbf16> to vector<1x8x12xbf16>
      tpu.vector_store %arg7[%c0_45, %c0_46, %c0_47], %49 {strides = array<i32>} : memref<10x8x12xbf16, #tpu.memory_space<vmem>>, vector<1x8x12xbf16>,
      %cst_48 = arith.constant 0.000000e+00 : bf16
      %50 = vector.broadcast %cst_48 : bf16 to vector<8x12xbf16>
      %c9 = arith.constant 9 : index
      %c0_49 = arith.constant 0 : index
      %c0_50 = arith.constant 0 : index
      %51 = vector.load %arg7[%c9, %c0_49, %c0_50] : memref<10x8x12xbf16, #tpu.memory_space<vmem>>, vector<1x8x12xbf16>
      %52 = vector.shape_cast %51 : vector<1x8x12xbf16> to vector<8x12xbf16>
      %53 = vector.shape_cast %50 : vector<8x12xbf16> to vector<1x8x12xbf16>
      tpu.vector_store %arg7[%c9, %c0_49, %c0_50], %53 {strides = array<i32>} : memref<10x8x12xbf16, #tpu.memory_space<vmem>>, vector<1x8x12xbf16>,
      %cst_51 = arith.constant 0.000000e+00 : f32
      %54 = vector.broadcast %cst_51 : f32 to vector<1x1x8xf32>
      %c0_52 = arith.constant 0 : index
      %c0_53 = arith.constant 0 : index
      %c0_54 = arith.constant 0 : index
      %55 = vector.load %arg5[%c0_52, %c0_53, %c0_54] : memref<1x1x8xf32, #tpu.memory_space<vmem>>, vector<1x1x8xf32>
      tpu.vector_store %arg5[%c0_52, %c0_53, %c0_54], %54 {strides = array<i32>} : memref<1x1x8xf32, #tpu.memory_space<vmem>>, vector<1x1x8xf32>,
      %cst_55 = arith.constant 0.000000e+00 : f32
      %56 = vector.broadcast %cst_55 : f32 to vector<1x1x8xf32>
      %c0_56 = arith.constant 0 : index
      %c0_57 = arith.constant 0 : index
      %c0_58 = arith.constant 0 : index
      %57 = vector.load %arg6[%c0_56, %c0_57, %c0_58] : memref<1x1x8xf32, #tpu.memory_space<vmem>>, vector<1x1x8xf32>
      tpu.vector_store %arg6[%c0_56, %c0_57, %c0_58], %56 {strides = array<i32>} : memref<1x1x8xf32, #tpu.memory_space<vmem>>, vector<1x1x8xf32>,
    } else {
    }
    %c0 = arith.constant 0 : index
    %c0_1 = arith.constant 0 : index
    %c0_2 = arith.constant 0 : index
    %c0_3 = arith.constant 0 : index
    %3 = vector.load %arg2[%c0, %c0_1, %c0_2, %c0_3] : memref<1x8x8x4xbf16, #tpu.memory_space<vmem>>, vector<1x8x8x4xbf16>
    %4 = vector.shape_cast %3 : vector<1x8x8x4xbf16> to vector<8x8x4xbf16>
    %cst = arith.constant 0.000000e+00 : bf16
    %5 = vector.broadcast %cst : bf16 to vector<8x1x4xbf16>
    %6 = vector.extract_strided_slice %4 {offsets = [0, 0, 0], sizes = [8, 7, 4], strides = [1, 1, 1]} : vector<8x8x4xbf16> to vector<8x7x4xbf16>
    %7 = tpu.concatenate %5, %6 in 1 : vector<8x1x4xbf16>, vector<8x7x4xbf16> -> vector<8x8x4xbf16>
    %8 = vector.extract_strided_slice %4 {offsets = [0, 1, 0], sizes = [8, 7, 4], strides = [1, 1, 1]} : vector<8x8x4xbf16> to vector<8x7x4xbf16>
    %9 = tpu.concatenate %8, %5 in 1 : vector<8x7x4xbf16>, vector<8x1x4xbf16> -> vector<8x8x4xbf16>
    %10 = tpu.concatenate %7, %4, %9 in 2 : vector<8x8x4xbf16>, vector<8x8x4xbf16>, vector<8x8x4xbf16> -> vector<8x8x12xbf16>
    %c1 = arith.constant 1 : index
    %c0_4 = arith.constant 0 : index
    %c0_5 = arith.constant 0 : index
    %11 = vector.load %arg7[%c1, %c0_4, %c0_5] : memref<10x8x12xbf16, #tpu.memory_space<vmem>>, vector<8x8x12xbf16>
    tpu.vector_store %arg7[%c1, %c0_4, %c0_5], %10 {strides = array<i32>} : memref<10x8x12xbf16, #tpu.memory_space<vmem>>, vector<8x8x12xbf16>,
    %cst_6 = arith.constant 0.000000e+00 : f32
    %12 = vector.broadcast %cst_6 : f32 to vector<64x8xf32>
    %c0_7 = arith.constant 0 : index
    %c0_8 = arith.constant 0 : index
    %c0_9 = arith.constant 0 : index
    %13 = vector.load %arg7[%c0_7, %c0_8, %c0_9] : memref<10x8x12xbf16, #tpu.memory_space<vmem>>, vector<8x8x12xbf16>
    %14 = vector.shape_cast %13 : vector<8x8x12xbf16> to vector<64x12xbf16>
    %c0_10 = arith.constant 0 : index
    %c0_11 = arith.constant 0 : index
    %c0_12 = arith.constant 0 : index
    %15 = vector.load %arg3[%c0_10, %c0_11, %c0_12] : memref<3x12x8xbf16, #tpu.memory_space<vmem>>, vector<1x12x8xbf16>
    %16 = vector.shape_cast %15 : vector<1x12x8xbf16> to vector<12x8xbf16>
    %cst_13 = arith.constant dense<0.000000e+00> : vector<64x8xf32>
    %17 = tpu.matmul %14, %16, %cst_13 {dimension_numbers = #tpu.dot_dimension_numbers<[1], [0], [0], [1], [0, 0, 1, 1], [], []>} : vector<64x12xbf16>, vector<12x8xbf16>, vector<64x8xf32> -> vector<64x8xf32>
    %18 = arith.addf %12, %17 : vector<64x8xf32>
    %c1_14 = arith.constant 1 : index
    %c0_15 = arith.constant 0 : index
    %c0_16 = arith.constant 0 : index
    %19 = vector.load %arg7[%c1_14, %c0_15, %c0_16] : memref<10x8x12xbf16, #tpu.memory_space<vmem>>, vector<8x8x12xbf16>
    %20 = vector.shape_cast %19 : vector<8x8x12xbf16> to vector<64x12xbf16>
    %c1_17 = arith.constant 1 : index
    %c0_18 = arith.constant 0 : index
    %c0_19 = arith.constant 0 : index
    %21 = vector.load %arg3[%c1_17, %c0_18, %c0_19] : memref<3x12x8xbf16, #tpu.memory_space<vmem>>, vector<1x12x8xbf16>
    %22 = vector.shape_cast %21 : vector<1x12x8xbf16> to vector<12x8xbf16>
    %cst_20 = arith.constant dense<0.000000e+00> : vector<64x8xf32>
    %23 = tpu.matmul %20, %22, %cst_20 {dimension_numbers = #tpu.dot_dimension_numbers<[1], [0], [0], [1], [0, 0, 1, 1], [], []>} : vector<64x12xbf16>, vector<12x8xbf16>, vector<64x8xf32> -> vector<64x8xf32>
    %24 = arith.addf %18, %23 : vector<64x8xf32>
    %c2 = arith.constant 2 : index
    %c0_21 = arith.constant 0 : index
    %c0_22 = arith.constant 0 : index
    %25 = vector.load %arg7[%c2, %c0_21, %c0_22] : memref<10x8x12xbf16, #tpu.memory_space<vmem>>, vector<8x8x12xbf16>
    %26 = vector.shape_cast %25 : vector<8x8x12xbf16> to vector<64x12xbf16>
    %c2_23 = arith.constant 2 : index
    %c0_24 = arith.constant 0 : index
    %c0_25 = arith.constant 0 : index
    %27 = vector.load %arg3[%c2_23, %c0_24, %c0_25] : memref<3x12x8xbf16, #tpu.memory_space<vmem>>, vector<1x12x8xbf16>
    %28 = vector.shape_cast %27 : vector<1x12x8xbf16> to vector<12x8xbf16>
    %cst_26 = arith.constant dense<0.000000e+00> : vector<64x8xf32>
    %29 = tpu.matmul %26, %28, %cst_26 {dimension_numbers = #tpu.dot_dimension_numbers<[1], [0], [0], [1], [0, 0, 1, 1], [], []>} : vector<64x12xbf16>, vector<12x8xbf16>, vector<64x8xf32> -> vector<64x8xf32>
    %30 = arith.addf %24, %29 : vector<64x8xf32>
    %31 = arith.truncf %30 : vector<64x8xf32> to vector<64x8xbf16>
    %c0_27 = arith.constant 0 : index
    %c0_28 = arith.constant 0 : index
    %c0_29 = arith.constant 0 : index
    %32 = vector.load %arg4[%c0_27, %c0_28, %c0_29] : memref<1x64x8xbf16, #tpu.memory_space<vmem>>, vector<1x64x8xbf16>
    %33 = vector.shape_cast %32 : vector<1x64x8xbf16> to vector<64x8xbf16>
    %34 = vector.shape_cast %31 : vector<64x8xbf16> to vector<1x64x8xbf16>
    tpu.vector_store %arg4[%c0_27, %c0_28, %c0_29], %34 {strides = array<i32>} : memref<1x64x8xbf16, #tpu.memory_space<vmem>>, vector<1x64x8xbf16>,
    %c0_30 = arith.constant 0 : index
    %c0_31 = arith.constant 0 : index
    %c0_32 = arith.constant 0 : index
    %35 = vector.load %arg5[%c0_30, %c0_31, %c0_32] : memref<1x1x8xf32, #tpu.memory_space<vmem>>, vector<1x1x8xf32>
    %cst_33 = arith.constant dense<0.000000e+00> : vector<8xf32>
    %36 = vector.multi_reduction <add>, %30, %cst_33 [0] : vector<64x8xf32> to vector<8xf32>
    %37 = vector.shape_cast %36 : vector<8xf32> to vector<1x1x8xf32>
    %38 = arith.addf %35, %37 : vector<1x1x8xf32>
    %c0_34 = arith.constant 0 : index
    %c0_35 = arith.constant 0 : index
    %c0_36 = arith.constant 0 : index
    %39 = vector.load %arg5[%c0_34, %c0_35, %c0_36] : memref<1x1x8xf32, #tpu.memory_space<vmem>>, vector<1x1x8xf32>
    tpu.vector_store %arg5[%c0_34, %c0_35, %c0_36], %38 {strides = array<i32>} : memref<1x1x8xf32, #tpu.memory_space<vmem>>, vector<1x1x8xf32>,
    %c0_37 = arith.constant 0 : index
    %c0_38 = arith.constant 0 : index
    %c0_39 = arith.constant 0 : index
    %40 = vector.load %arg6[%c0_37, %c0_38, %c0_39] : memref<1x1x8xf32, #tpu.memory_space<vmem>>, vector<1x1x8xf32>
    %41 = arith.mulf %30, %30 : vector<64x8xf32>
    %cst_40 = arith.constant dense<0.000000e+00> : vector<8xf32>
    %42 = vector.multi_reduction <add>, %41, %cst_40 [0] : vector<64x8xf32> to vector<8xf32>
    %43 = vector.shape_cast %42 : vector<8xf32> to vector<1x1x8xf32>
    %44 = arith.addf %40, %43 : vector<1x1x8xf32>
    %c0_41 = arith.constant 0 : index
    %c0_42 = arith.constant 0 : index
    %c0_43 = arith.constant 0 : index
    %45 = vector.load %arg6[%c0_41, %c0_42, %c0_43] : memref<1x1x8xf32, #tpu.memory_space<vmem>>, vector<1x1x8xf32>
    tpu.vector_store %arg6[%c0_41, %c0_42, %c0_43], %44 {strides = array<i32>} : memref<1x1x8xf32, #tpu.memory_space<vmem>>, vector<1x1x8xf32>,
    return
  }
  func.func @transform_0(%arg0: i32, %arg1: i32) -> (i32, i32, i32, i32) {
    %c1_i32 = arith.constant 1 : i32
    %0 = arith.muli %arg0, %c1_i32 : i32
    %1 = arith.addi %0, %arg1 : i32
    %c0_i32 = arith.constant 0 : i32
    %c0_i32_0 = arith.constant 0 : i32
    %c0_i32_1 = arith.constant 0 : i32
    %c0_i32_2 = arith.constant 0 : i32
    return %1, %c0_i32, %c0_i32_0, %c0_i32_1 : i32, i32, i32, i32
  }
  func.func @transform_1(%arg0: i32, %arg1: i32) -> (i32, i32, i32) {
    %c0_i32 = arith.constant 0 : i32
    %c0_i32_0 = arith.constant 0 : i32
    %c0_i32_1 = arith.constant 0 : i32
    %c0_i32_2 = arith.constant 0 : i32
    return %c0_i32, %c0_i32_0, %c0_i32_1 : i32, i32, i32
  }
  func.func @transform_2(%arg0: i32, %arg1: i32) -> (i32, i32, i32) {
    %c1_i32 = arith.constant 1 : i32
    %0 = arith.muli %arg0, %c1_i32 : i32
    %1 = arith.addi %0, %arg1 : i32
    %c0_i32 = arith.constant 0 : i32
    %c0_i32_0 = arith.constant 0 : i32
    %c0_i32_1 = arith.constant 0 : i32
    return %1, %c0_i32, %c0_i32_0 : i32, i32, i32
  }
  func.func @transform_3(%arg0: i32, %arg1: i32) -> (i32, i32, i32) {
    %c0_i32 = arith.constant 0 : i32
    %c0_i32_0 = arith.constant 0 : i32
    %c0_i32_1 = arith.constant 0 : i32
    return %arg0, %c0_i32, %c0_i32_0 : i32, i32, i32
  }
  func.func @transform_4(%arg0: i32, %arg1: i32) -> (i32, i32, i32) {
    %c0_i32 = arith.constant 0 : i32
    %c0_i32_0 = arith.constant 0 : i32
    %c0_i32_1 = arith.constant 0 : i32
    return %arg0, %c0_i32, %c0_i32_0 : i32, i32, i32
  }
}

module attributes {stable_mosaic.version = 11 : i64} {
  func.func @_bn_relu_conv2_kernel(%arg0: i32, %arg1: i32, %arg2: memref<1x64x8xbf16, #tpu.memory_space<vmem>>, %arg3: memref<1x8xf32, #tpu.memory_space<vmem>>, %arg4: memref<1x8xf32, #tpu.memory_space<vmem>>, %arg5: memref<3x24x8xbf16, #tpu.memory_space<vmem>>, %arg6: memref<1x64x8xbf16, #tpu.memory_space<vmem>>, %arg7: memref<1x1x8xf32, #tpu.memory_space<vmem>>, %arg8: memref<1x1x8xf32, #tpu.memory_space<vmem>>, %arg9: memref<10x8x24xbf16, #tpu.memory_space<vmem>>) attributes {dimension_semantics = [#tpu.dimension_semantics<parallel>, #tpu.dimension_semantics<arbitrary>], iteration_bounds = array<i64: 2, 1>, scalar_prefetch = 0 : i64, scratch_operands = 1 : i64, tpu.core_type = #tpu.core_type<tc>, window_params = [{transform_indices = @transform_0, window_bounds = array<i64: 1, 64, 8>}, {pipeline_mode = #tpu.pipeline_mode<synchronous>, transform_indices = @transform_1, window_bounds = array<i64: 1, 8>}, {pipeline_mode = #tpu.pipeline_mode<synchronous>, transform_indices = @transform_2, window_bounds = array<i64: 1, 8>}, {pipeline_mode = #tpu.pipeline_mode<synchronous>, transform_indices = @transform_3, window_bounds = array<i64: 3, 24, 8>}, {transform_indices = @transform_4, window_bounds = array<i64: 1, 64, 8>}, {transform_indices = @transform_5, window_bounds = array<i64: 1, 1, 8>}, {transform_indices = @transform_6, window_bounds = array<i64: 1, 1, 8>}]} {
    %c0_i32 = arith.constant 0 : i32
    %0 = arith.cmpi eq, %arg1, %c0_i32 : i32
    %1 = arith.extui %0 : i1 to i32
    %c0_i32_0 = arith.constant 0 : i32
    %2 = arith.cmpi ne, %1, %c0_i32_0 : i32
    scf.if %2 {
      %cst_48 = arith.constant 0.000000e+00 : bf16
      %61 = vector.broadcast %cst_48 : bf16 to vector<8x24xbf16>
      %c0_49 = arith.constant 0 : index
      %c0_50 = arith.constant 0 : index
      %c0_51 = arith.constant 0 : index
      %62 = vector.load %arg9[%c0_49, %c0_50, %c0_51] : memref<10x8x24xbf16, #tpu.memory_space<vmem>>, vector<1x8x24xbf16>
      %63 = vector.shape_cast %62 : vector<1x8x24xbf16> to vector<8x24xbf16>
      %64 = vector.shape_cast %61 : vector<8x24xbf16> to vector<1x8x24xbf16>
      tpu.vector_store %arg9[%c0_49, %c0_50, %c0_51], %64 {strides = array<i32>} : memref<10x8x24xbf16, #tpu.memory_space<vmem>>, vector<1x8x24xbf16>,
      %cst_52 = arith.constant 0.000000e+00 : bf16
      %65 = vector.broadcast %cst_52 : bf16 to vector<8x24xbf16>
      %c9 = arith.constant 9 : index
      %c0_53 = arith.constant 0 : index
      %c0_54 = arith.constant 0 : index
      %66 = vector.load %arg9[%c9, %c0_53, %c0_54] : memref<10x8x24xbf16, #tpu.memory_space<vmem>>, vector<1x8x24xbf16>
      %67 = vector.shape_cast %66 : vector<1x8x24xbf16> to vector<8x24xbf16>
      %68 = vector.shape_cast %65 : vector<8x24xbf16> to vector<1x8x24xbf16>
      tpu.vector_store %arg9[%c9, %c0_53, %c0_54], %68 {strides = array<i32>} : memref<10x8x24xbf16, #tpu.memory_space<vmem>>, vector<1x8x24xbf16>,
      %cst_55 = arith.constant 0.000000e+00 : f32
      %69 = vector.broadcast %cst_55 : f32 to vector<1x1x8xf32>
      %c0_56 = arith.constant 0 : index
      %c0_57 = arith.constant 0 : index
      %c0_58 = arith.constant 0 : index
      %70 = vector.load %arg7[%c0_56, %c0_57, %c0_58] : memref<1x1x8xf32, #tpu.memory_space<vmem>>, vector<1x1x8xf32>
      tpu.vector_store %arg7[%c0_56, %c0_57, %c0_58], %69 {strides = array<i32>} : memref<1x1x8xf32, #tpu.memory_space<vmem>>, vector<1x1x8xf32>,
      %cst_59 = arith.constant 0.000000e+00 : f32
      %71 = vector.broadcast %cst_59 : f32 to vector<1x1x8xf32>
      %c0_60 = arith.constant 0 : index
      %c0_61 = arith.constant 0 : index
      %c0_62 = arith.constant 0 : index
      %72 = vector.load %arg8[%c0_60, %c0_61, %c0_62] : memref<1x1x8xf32, #tpu.memory_space<vmem>>, vector<1x1x8xf32>
      tpu.vector_store %arg8[%c0_60, %c0_61, %c0_62], %71 {strides = array<i32>} : memref<1x1x8xf32, #tpu.memory_space<vmem>>, vector<1x1x8xf32>,
    } else {
    }
    %c0 = arith.constant 0 : index
    %c0_1 = arith.constant 0 : index
    %c0_2 = arith.constant 0 : index
    %3 = vector.load %arg2[%c0, %c0_1, %c0_2] : memref<1x64x8xbf16, #tpu.memory_space<vmem>>, vector<1x64x8xbf16>
    %4 = vector.shape_cast %3 : vector<1x64x8xbf16> to vector<64x8xbf16>
    %5 = arith.extf %4 : vector<64x8xbf16> to vector<64x8xf32>
    %c0_3 = arith.constant 0 : index
    %c0_4 = arith.constant 0 : index
    %6 = vector.load %arg3[%c0_3, %c0_4] : memref<1x8xf32, #tpu.memory_space<vmem>>, vector<1x8xf32>
    %7 = vector.shape_cast %6 : vector<1x8xf32> to vector<8xf32>
    %8 = vector.shape_cast %7 : vector<8xf32> to vector<1x8xf32>
    %9 = vector.broadcast %8 : vector<1x8xf32> to vector<64x8xf32>
    %10 = arith.mulf %5, %9 : vector<64x8xf32>
    %c0_5 = arith.constant 0 : index
    %c0_6 = arith.constant 0 : index
    %11 = vector.load %arg4[%c0_5, %c0_6] : memref<1x8xf32, #tpu.memory_space<vmem>>, vector<1x8xf32>
    %12 = vector.shape_cast %11 : vector<1x8xf32> to vector<8xf32>
    %13 = vector.shape_cast %12 : vector<8xf32> to vector<1x8xf32>
    %14 = vector.broadcast %13 : vector<1x8xf32> to vector<64x8xf32>
    %15 = arith.addf %10, %14 : vector<64x8xf32>
    %cst = arith.constant 0.000000e+00 : f32
    %16 = vector.broadcast %cst : f32 to vector<64x8xf32>
    %17 = arith.maximumf %15, %16 : vector<64x8xf32>
    %18 = vector.shape_cast %17 : vector<64x8xf32> to vector<8x8x8xf32>
    %19 = arith.truncf %18 : vector<8x8x8xf32> to vector<8x8x8xbf16>
    %cst_7 = arith.constant 0.000000e+00 : bf16
    %20 = vector.broadcast %cst_7 : bf16 to vector<8x1x8xbf16>
    %21 = vector.extract_strided_slice %19 {offsets = [0, 0, 0], sizes = [8, 7, 8], strides = [1, 1, 1]} : vector<8x8x8xbf16> to vector<8x7x8xbf16>
    %22 = tpu.concatenate %20, %21 in 1 : vector<8x1x8xbf16>, vector<8x7x8xbf16> -> vector<8x8x8xbf16>
    %23 = vector.extract_strided_slice %19 {offsets = [0, 1, 0], sizes = [8, 7, 8], strides = [1, 1, 1]} : vector<8x8x8xbf16> to vector<8x7x8xbf16>
    %24 = tpu.concatenate %23, %20 in 1 : vector<8x7x8xbf16>, vector<8x1x8xbf16> -> vector<8x8x8xbf16>
    %25 = tpu.concatenate %22, %19, %24 in 2 : vector<8x8x8xbf16>, vector<8x8x8xbf16>, vector<8x8x8xbf16> -> vector<8x8x24xbf16>
    %c1 = arith.constant 1 : index
    %c0_8 = arith.constant 0 : index
    %c0_9 = arith.constant 0 : index
    %26 = vector.load %arg9[%c1, %c0_8, %c0_9] : memref<10x8x24xbf16, #tpu.memory_space<vmem>>, vector<8x8x24xbf16>
    tpu.vector_store %arg9[%c1, %c0_8, %c0_9], %25 {strides = array<i32>} : memref<10x8x24xbf16, #tpu.memory_space<vmem>>, vector<8x8x24xbf16>,
    %cst_10 = arith.constant 0.000000e+00 : f32
    %27 = vector.broadcast %cst_10 : f32 to vector<64x8xf32>
    %c0_11 = arith.constant 0 : index
    %c0_12 = arith.constant 0 : index
    %c0_13 = arith.constant 0 : index
    %28 = vector.load %arg9[%c0_11, %c0_12, %c0_13] : memref<10x8x24xbf16, #tpu.memory_space<vmem>>, vector<8x8x24xbf16>
    %29 = vector.shape_cast %28 : vector<8x8x24xbf16> to vector<64x24xbf16>
    %c0_14 = arith.constant 0 : index
    %c0_15 = arith.constant 0 : index
    %c0_16 = arith.constant 0 : index
    %30 = vector.load %arg5[%c0_14, %c0_15, %c0_16] : memref<3x24x8xbf16, #tpu.memory_space<vmem>>, vector<1x24x8xbf16>
    %31 = vector.shape_cast %30 : vector<1x24x8xbf16> to vector<24x8xbf16>
    %cst_17 = arith.constant dense<0.000000e+00> : vector<64x8xf32>
    %32 = tpu.matmul %29, %31, %cst_17 {dimension_numbers = #tpu.dot_dimension_numbers<[1], [0], [0], [1], [0, 0, 1, 1], [], []>} : vector<64x24xbf16>, vector<24x8xbf16>, vector<64x8xf32> -> vector<64x8xf32>
    %33 = arith.addf %27, %32 : vector<64x8xf32>
    %c1_18 = arith.constant 1 : index
    %c0_19 = arith.constant 0 : index
    %c0_20 = arith.constant 0 : index
    %34 = vector.load %arg9[%c1_18, %c0_19, %c0_20] : memref<10x8x24xbf16, #tpu.memory_space<vmem>>, vector<8x8x24xbf16>
    %35 = vector.shape_cast %34 : vector<8x8x24xbf16> to vector<64x24xbf16>
    %c1_21 = arith.constant 1 : index
    %c0_22 = arith.constant 0 : index
    %c0_23 = arith.constant 0 : index
    %36 = vector.load %arg5[%c1_21, %c0_22, %c0_23] : memref<3x24x8xbf16, #tpu.memory_space<vmem>>, vector<1x24x8xbf16>
    %37 = vector.shape_cast %36 : vector<1x24x8xbf16> to vector<24x8xbf16>
    %cst_24 = arith.constant dense<0.000000e+00> : vector<64x8xf32>
    %38 = tpu.matmul %35, %37, %cst_24 {dimension_numbers = #tpu.dot_dimension_numbers<[1], [0], [0], [1], [0, 0, 1, 1], [], []>} : vector<64x24xbf16>, vector<24x8xbf16>, vector<64x8xf32> -> vector<64x8xf32>
    %39 = arith.addf %33, %38 : vector<64x8xf32>
    %c2 = arith.constant 2 : index
    %c0_25 = arith.constant 0 : index
    %c0_26 = arith.constant 0 : index
    %40 = vector.load %arg9[%c2, %c0_25, %c0_26] : memref<10x8x24xbf16, #tpu.memory_space<vmem>>, vector<8x8x24xbf16>
    %41 = vector.shape_cast %40 : vector<8x8x24xbf16> to vector<64x24xbf16>
    %c2_27 = arith.constant 2 : index
    %c0_28 = arith.constant 0 : index
    %c0_29 = arith.constant 0 : index
    %42 = vector.load %arg5[%c2_27, %c0_28, %c0_29] : memref<3x24x8xbf16, #tpu.memory_space<vmem>>, vector<1x24x8xbf16>
    %43 = vector.shape_cast %42 : vector<1x24x8xbf16> to vector<24x8xbf16>
    %cst_30 = arith.constant dense<0.000000e+00> : vector<64x8xf32>
    %44 = tpu.matmul %41, %43, %cst_30 {dimension_numbers = #tpu.dot_dimension_numbers<[1], [0], [0], [1], [0, 0, 1, 1], [], []>} : vector<64x24xbf16>, vector<24x8xbf16>, vector<64x8xf32> -> vector<64x8xf32>
    %45 = arith.addf %39, %44 : vector<64x8xf32>
    %46 = arith.truncf %45 : vector<64x8xf32> to vector<64x8xbf16>
    %c0_31 = arith.constant 0 : index
    %c0_32 = arith.constant 0 : index
    %c0_33 = arith.constant 0 : index
    %47 = vector.load %arg6[%c0_31, %c0_32, %c0_33] : memref<1x64x8xbf16, #tpu.memory_space<vmem>>, vector<1x64x8xbf16>
    %48 = vector.shape_cast %47 : vector<1x64x8xbf16> to vector<64x8xbf16>
    %49 = vector.shape_cast %46 : vector<64x8xbf16> to vector<1x64x8xbf16>
    tpu.vector_store %arg6[%c0_31, %c0_32, %c0_33], %49 {strides = array<i32>} : memref<1x64x8xbf16, #tpu.memory_space<vmem>>, vector<1x64x8xbf16>,
    %c0_34 = arith.constant 0 : index
    %c0_35 = arith.constant 0 : index
    %c0_36 = arith.constant 0 : index
    %50 = vector.load %arg7[%c0_34, %c0_35, %c0_36] : memref<1x1x8xf32, #tpu.memory_space<vmem>>, vector<1x1x8xf32>
    %cst_37 = arith.constant dense<0.000000e+00> : vector<8xf32>
    %51 = vector.multi_reduction <add>, %45, %cst_37 [0] : vector<64x8xf32> to vector<8xf32>
    %52 = vector.shape_cast %51 : vector<8xf32> to vector<1x1x8xf32>
    %53 = arith.addf %50, %52 : vector<1x1x8xf32>
    %c0_38 = arith.constant 0 : index
    %c0_39 = arith.constant 0 : index
    %c0_40 = arith.constant 0 : index
    %54 = vector.load %arg7[%c0_38, %c0_39, %c0_40] : memref<1x1x8xf32, #tpu.memory_space<vmem>>, vector<1x1x8xf32>
    tpu.vector_store %arg7[%c0_38, %c0_39, %c0_40], %53 {strides = array<i32>} : memref<1x1x8xf32, #tpu.memory_space<vmem>>, vector<1x1x8xf32>,
    %c0_41 = arith.constant 0 : index
    %c0_42 = arith.constant 0 : index
    %c0_43 = arith.constant 0 : index
    %55 = vector.load %arg8[%c0_41, %c0_42, %c0_43] : memref<1x1x8xf32, #tpu.memory_space<vmem>>, vector<1x1x8xf32>
    %56 = arith.mulf %45, %45 : vector<64x8xf32>
    %cst_44 = arith.constant dense<0.000000e+00> : vector<8xf32>
    %57 = vector.multi_reduction <add>, %56, %cst_44 [0] : vector<64x8xf32> to vector<8xf32>
    %58 = vector.shape_cast %57 : vector<8xf32> to vector<1x1x8xf32>
    %59 = arith.addf %55, %58 : vector<1x1x8xf32>
    %c0_45 = arith.constant 0 : index
    %c0_46 = arith.constant 0 : index
    %c0_47 = arith.constant 0 : index
    %60 = vector.load %arg8[%c0_45, %c0_46, %c0_47] : memref<1x1x8xf32, #tpu.memory_space<vmem>>, vector<1x1x8xf32>
    tpu.vector_store %arg8[%c0_45, %c0_46, %c0_47], %59 {strides = array<i32>} : memref<1x1x8xf32, #tpu.memory_space<vmem>>, vector<1x1x8xf32>,
    return
  }
  func.func @transform_0(%arg0: i32, %arg1: i32) -> (i32, i32, i32) {
    %c1_i32 = arith.constant 1 : i32
    %0 = arith.muli %arg0, %c1_i32 : i32
    %1 = arith.addi %0, %arg1 : i32
    %c0_i32 = arith.constant 0 : i32
    %c0_i32_0 = arith.constant 0 : i32
    %c0_i32_1 = arith.constant 0 : i32
    return %1, %c0_i32, %c0_i32_0 : i32, i32, i32
  }
  func.func @transform_1(%arg0: i32, %arg1: i32) -> (i32, i32) {
    %c0_i32 = arith.constant 0 : i32
    %c0_i32_0 = arith.constant 0 : i32
    %c0_i32_1 = arith.constant 0 : i32
    return %c0_i32, %c0_i32_0 : i32, i32
  }
  func.func @transform_2(%arg0: i32, %arg1: i32) -> (i32, i32) {
    %c0_i32 = arith.constant 0 : i32
    %c0_i32_0 = arith.constant 0 : i32
    %c0_i32_1 = arith.constant 0 : i32
    return %c0_i32, %c0_i32_0 : i32, i32
  }
  func.func @transform_3(%arg0: i32, %arg1: i32) -> (i32, i32, i32) {
    %c0_i32 = arith.constant 0 : i32
    %c0_i32_0 = arith.constant 0 : i32
    %c0_i32_1 = arith.constant 0 : i32
    %c0_i32_2 = arith.constant 0 : i32
    return %c0_i32, %c0_i32_0, %c0_i32_1 : i32, i32, i32
  }
  func.func @transform_4(%arg0: i32, %arg1: i32) -> (i32, i32, i32) {
    %c1_i32 = arith.constant 1 : i32
    %0 = arith.muli %arg0, %c1_i32 : i32
    %1 = arith.addi %0, %arg1 : i32
    %c0_i32 = arith.constant 0 : i32
    %c0_i32_0 = arith.constant 0 : i32
    %c0_i32_1 = arith.constant 0 : i32
    return %1, %c0_i32, %c0_i32_0 : i32, i32, i32
  }
  func.func @transform_5(%arg0: i32, %arg1: i32) -> (i32, i32, i32) {
    %c0_i32 = arith.constant 0 : i32
    %c0_i32_0 = arith.constant 0 : i32
    %c0_i32_1 = arith.constant 0 : i32
    return %arg0, %c0_i32, %c0_i32_0 : i32, i32, i32
  }
  func.func @transform_6(%arg0: i32, %arg1: i32) -> (i32, i32, i32) {
    %c0_i32 = arith.constant 0 : i32
    %c0_i32_0 = arith.constant 0 : i32
    %c0_i32_1 = arith.constant 0 : i32
    return %arg0, %c0_i32, %c0_i32_0 : i32, i32, i32
  }
}

</mosaic_0001>

<bundles_post_ra>
// kernel: down_forward.2
= control target key start
LH: loop header
LB: loop body
LE: loop exit
PB: predicated region body
PF: predicated region fallthrough
CT: control target
= control target key end

     0   :  { %s1141_s15 = smov 0   ;;  %s1143_s16 = smov 0   ;;  %s1459_s0 = inlined_call_operand.vmem [shape: bf16[2,8,8,4], index: 0, kind: input, shape index: {}]   ;;  %s1460_s1 = inlined_call_operand.vmem [shape: bf16[3,12,8], index: 1, kind: input, shape index: {}]   ;;  %s1461_s2 = inlined_call_operand.vmem [shape: bf16[2,64,8], index: 2, kind: output, shape index: {0}]   ;;  %s1462_s3 = inlined_call_operand.vmem [shape: f32[2,1,8], index: 3, kind: output, shape index: {1}]   ;;  %s1463_s4 = inlined_call_operand.vmem [shape: f32[2,1,8], index: 4, kind: output, shape index: {2}]  }
   0x1   :  { %s1145_s17 = smov 0  }
   0x2 LB: > { %s27_s18 = sadd.s32 1, %s1106_s16  ;;  %p938_p0 = scmp.ge.s32.totalorder %s1110_s17, 1  ;;  %s1110_s17 = sphi %s1145_s17, %s15_s17   ;;  %s1106_s16 = sphi %s1143_s16, %s1469_s16   ;;  %s1102_s15 = sphi %s1141_s15, %s1468_s15  }
   0x3   : > { %p29_p1 = scmp.ge.s32.totalorder %s27_s18, 2  ;;  %p185_p2 = scmp.lt.s32.totalorder %s1110_s17, 3 }
   0x5   : > { %s1471_s18 = smov (%p29_p1, %s27_s18), 0  ;;  %p186_p3 = pnand %p938_p0, %p185_p2 }
   0x6   : > { %p220_p4 = scmp.lt.s32.totalorder (!%p186_p3), %s1102_s15, 1  ;;  %s1112_s23 = smov (!%p186_p3), 4  }
   0x7   : > { %189 = sbr.rel (%p186_p3) target bundleno = 363 (0x16b), region = 28  ;;  %s1113_s24 = smov (!%p186_p3), 8  }
   0xc   : > { %s1473_s15 = smov (!%p220_p4, %s1102_s15), 1  ;;  %vm382_vm0 = vcmask 1043456   ;;  %vm383_vm1 = vsmask.f32 3328  ;;  %vm244_vm3 = vcmask 93184   ;;  %v1114_v61 = vmov 0  }
   0xd   : > { %s1021_s19 = sshll.u32 %s1473_s15, 5  ;;  %vm1188_vm2 = vmand %vm382_vm0, %vm383_vm1  ;;  %245 = vst.msk [vmem:[#allocation2] sm:$0xf] %vm244_vm3, %v1114_v61  ;;  %v963_v62 = vld [vmem:[%s1460_s1 + $0x8] sm:$0xf]  ;;  %vm552_vm4 = vcmask 1045504   ;;  %s1402_s21 = scalar_lea.vmem %s1462_s3, %s1473_s15 }
   0xe   : > { %s1167_s22 = scalar_lea.vmem %s1459_s0, %s1021_s19  ;;  %247 = vst.msk [vmem:[#allocation2 + $0x24] sm:$0xf] %vm244_vm3, %v1114_v61  ;;  %v1032_v63 = vld [vmem:[%s1460_s1 + $0x8] sm:$0x30]  ;;  %v1037_v16 = vld [vmem:[%s1460_s1 + $0x10] sm:$0x30]  ;;  %s1394_s13 = scalar_lea.vmem %s1461_s2, %s1021_s19 }
   0xf   : > { %v1039_v0 = vld [vmem:[%s1167_s22] sm:$0xff]   ;;  %v1054_v1 = vld [vmem:[%s1167_s22 + $0x8] sm:$0xff]   ;;  %v1055_v8 = vld [vmem:[%s1167_s22 + $0x10] sm:$0xff]   ;;  %vm347_vm5 = vcmask 1040384   ;;  %vm348_vm6 = vsmask.f32 256 }
  0x10   : > { %v1040_v2 = vunpack.c.l.b16 %v1039_v0  ;;  %v1041_v3 = vunpack.c.h.b16 %v1039_v0  ;;  %v1044_v4 = vunpack.c.l.b16 %v1054_v1  ;;  %v1045_v12 = vunpack.c.h.b16 %v1054_v1  ;;  %v1056_v38 = vld [vmem:[%s1167_s22 + $0x18] sm:$0xff]   ;;  %v987_v1 = vld [vmem:[%s1460_s1] sm:$0xf]  ;;  %vm1305_vm7 = vmand %vm347_vm5, %vm348_vm6 }
  0x11   : > { %v1048_v14 = vunpack.c.l.b16 %v1055_v8  ;;  %v1049_v17 = vunpack.c.h.b16 %v1055_v8  ;;  %v1052_v42 = vunpack.c.l.b16 %v1056_v38  ;;  %v1053_v44 = vunpack.c.h.b16 %v1056_v38 }
  0x12   : > { %v1171_v5 = vpack.c.b16 %v1040_v2, %v1040_v2  ;;  %v1173_v6 = vpack.c.b16 %v1041_v3, %v1041_v3  ;;  %v1175_v7 = vpack.c.b16 %v1044_v4, %v1044_v4  ;;  %v1197_v21 = vpack.c.b16 %v1045_v12, %v1045_v12  ;;  %v1027_v2 = vld [vmem:[%s1460_s1] sm:$0x30] }
  0x13   : > { %v1202_v24 = vpack.c.b16 %v1048_v14, %v1048_v14  ;;  %v1207_v26 = vpack.c.b16 %v1049_v17, %v1049_v17  ;;  %v1246_v47 = vpack.c.b16 %v1052_v42, %v1052_v42  ;;  %v1250_v49 = vpack.c.b16 %v1053_v44, %v1053_v44 }
  0x14   : > { %393 = vrot.lane.b32.xlu0 %v1171_v5, %s1112_s23  ;;  %v284_v9 = vshrl.u32 %v1171_v5, 16  ;;  %v287_v10 = vshll.u32 %v1171_v5, 16  ;;  %v294_v11 = vshll.u32 %v1173_v6, 16  ;;  %397 = vrot.lane.b32.xlu2 %v1175_v7, %s1112_s23  ;;  %v301_v13 = vshll.u32 %v1175_v7, 16 }
  0x15   : > { %v291_v19 = vshrl.u32 %v1173_v6, 16  ;;  %v298_v22 = vshrl.u32 %v1175_v7, 16  ;;  %v308_v28 = vshll.u32 %v1197_v21, 16  ;;  %v315_v30 = vshll.u32 %v1202_v24, 16 }
  0x16   : > { %v358_v15 = vrot.slane %v287_v10, 1  ;;  %v360_v20 = vrot.slane %v294_v11, 1  ;;  %v362_v23 = vrot.slane %v301_v13, 1  ;;  %v322_v31 = vshll.u32 %v1207_v26, 16 }
  0x17   : > { %v305_v33 = vshrl.u32 %v1197_v21, 16  ;;  %v364_v34 = vrot.slane %v308_v28, 1  ;;  %v312_v35 = vshrl.u32 %v1202_v24, 16  ;;  %v366_v37 = vrot.slane %v315_v30, 1 }
  0x18   : > { %v359_v18 = vor.u32 %v358_v15, %v284_v9  ;;  %v361_v27 = vor.u32 %v360_v20, %v291_v19  ;;  %v363_v29 = vor.u32 %v362_v23, %v298_v22  ;;  %v319_v39 = vshrl.u32 %v1207_v26, 16  ;;  %v1013_v15 = vld [vmem:[%s1460_s1 + $0x10] sm:$0xf] }
  0x19   : > { %v368_v40 = vrot.slane %v322_v31, 1  ;;  %v365_v41 = vor.u32 %v364_v34, %v305_v33  ;;  %v367_v43 = vor.u32 %v366_v37, %v312_v35  ;;  %v329_v51 = vshll.u32 %v1246_v47, 16 }
  0x1a   : > { %v385_v25 = vsel %vm1188_vm2, %v359_v18, 0  ;;  %v386_v32 = vsel %vm1188_vm2, %v361_v27, 0  ;;  %v387_v36 = vsel %vm1188_vm2, %v363_v29, 0  ;;  %v336_v52 = vshll.u32 %v1250_v49, 16 }
  0x1b   : > { %417 = vrot.lane.b32.xlu1 %v385_v25, %s1113_s24  ;;  %v369_v45 = vor.u32 %v368_v40, %v319_v39  ;;  %v388_v46 = vsel %vm1188_vm2, %v365_v41, 0  ;;  %v389_v48 = vsel %vm1188_vm2, %v367_v43, 0  ;;  %v326_v53 = vshrl.u32 %v1246_v47, 16 }
  0x1c   : > { %395 = vrot.lane.b32.xlu0 %v1173_v6, %s1112_s23  ;;  %399 = vrot.lane.b32.xlu2 %v1197_v21, %s1112_s23  ;;  %v370_v54 = vrot.slane %v329_v51, 1  ;;  %v333_v55 = vshrl.u32 %v1250_v49, 16  ;;  %v372_v56 = vrot.slane %v336_v52, 1  ;;  %v964_v0 = vor.u32 %v1032_v63, %v963_v62 }
  0x1d   : > { %v390_v50 = vsel %vm1188_vm2, %v369_v45, 0  ;;  %v988_v3 = vor.u32 %v1027_v2, %v987_v1  ;;  %v286_v14 = vrot.slane %v284_v9, 7  ;;  %v1014_v17 = vor.u32 %v1037_v16, %v1013_v15 }
  0x1e   : > { %v371_v57 = vor.u32 %v370_v54, %v326_v53  ;;  %v373_v58 = vor.u32 %v372_v56, %v333_v55  ;;  %v554_v4 = vsel %vm552_vm4, %v964_v0, 0  ;;  %v293_v9 = vrot.slane %v291_v19, 7 }
  0x1f   : > { %563 = vmatpush.bf16.msra.mxu0 %v554_v4  ;;  %v623_v8 = vsel %vm552_vm4, %v988_v3, 0  ;;  %1057 = vmatpush.bf16.msra.mxu3 %v554_v4  ;;  %v704_v18 = vsel %vm552_vm4, %v1014_v17, 0  ;;  %v289_v23 = vor.u32 %v287_v10, %v286_v14  ;;  %vm433_vm8 = vcmask 31744  }
  0x20   : > { %v391_v59 = vsel %vm1188_vm2, %v371_v57, 0  ;;  %v392_v60 = vsel %vm1188_vm2, %v373_v58, 0  ;;  %1058 = vmatpush.bf16.msra.mxu1 %v623_v8  ;;  %1059 = vmatpush.bf16.msra.mxu2 %v704_v18  ;;  %v300_v29 = vrot.slane %v298_v22, 7  ;;  %vm458_vm9 = vcmask 64512  }
  0x21   : > { %v350_v27 = vsel %vm1305_vm7, 0, %v289_v23  ;;  %v314_v38 = vrot.slane %v312_v35, 7  ;;  %v307_v22 = vrot.slane %v305_v33, 7  ;;  %vm539_vm10 = vcmask 97280  }
  0x22   : > { %v303_v19 = vor.u32 %v301_v13, %v300_v29  ;;  %vm751_vm11 = vcmask 60416   ;;  %vm248_vm12 = vcmask 57344  }
  0x23   : > { %419 = vrot.lane.b32.xlu1 %v386_v32, %s1113_s24  ;;  %632 = vmatpush.bf16.msrb.mxu0 %v623_v8  ;;  %v317_v7 = vor.u32 %v315_v30, %v314_v38  ;;  %v310_v35 = vor.u32 %v308_v28, %v307_v22  ;;  %v321_v30 = vrot.slane %v319_v39, 7  ;;  %v328_v39 = vrot.slane %v326_v53, 7 }
  0x24   : > { %421 = vrot.lane.b32.xlu0 %v387_v36, %s1113_s24  ;;  %401 = vrot.lane.b32.xlu2 %v1202_v24, %s1112_s23  ;;  %v296_v36 = vor.u32 %v294_v11, %v293_v9  ;;  %v352_v41 = vsel %vm1305_vm7, 0, %v303_v19 }
  0x25   : > { %v354_v45 = vsel %vm1305_vm7, 0, %v317_v7  ;;  %v353_v24 = vsel %vm1305_vm7, 0, %v310_v35  ;;  %v324_v58 = vor.u32 %v322_v31, %v321_v30  ;;  %v1115_v7 = vmov 0.0  }
  0x26   : > { %v351_v40 = vsel %vm1305_vm7, 0, %v296_v36  ;;  %249 = vst.msk [vmem:[%s1402_s21] sm:$0x1] %vm248_vm12, %v1115_v7 }
  0x27   : > { %v355_v61 = vsel %vm1305_vm7, 0, %v324_v58 }
  0x2b   : > { %423 = vrot.lane.b32.xlu1 %v388_v46, %s1113_s24 }
  0x2c   : > { %425 = vrot.lane.b32.xlu0 %v389_v48, %s1113_s24  ;;  %427 = vrot.lane.b32.xlu2 %v390_v50, %s1113_s24 }
  0x33   : > { %403 = vrot.lane.b32.xlu1 %v1207_v26, %s1112_s23  ;;  %v331_v26 = vor.u32 %v329_v51, %v328_v39 }
  0x34   : > { %405 = vrot.lane.b32.xlu0 %v1246_v47, %s1112_s23  ;;  %407 = vrot.lane.b32.xlu2 %v1250_v49, %s1112_s23  ;;  %s1408_s23 = scalar_lea.vmem %s1463_s4, %s1473_s15 }
  0x35   : > { %v356_v2 = vsel %vm1305_vm7, 0, %v331_v26  ;;  %250 = vst.msk [vmem:[%s1408_s23] sm:$0x1] %vm248_vm12, %v1115_v7 }
  0x3b   : > { %429 = vrot.lane.b32.xlu1 %v391_v59, %s1113_s24 }
  0x3c   : > { %431 = vrot.lane.b32.xlu0 %v392_v60, %s1113_s24  ;;  %v335_v60 = vrot.slane %v333_v55, 7 }
  0x3e   : > { %v338_v53 = vor.u32 %v336_v52, %v335_v60 }
  0x40   : > { %v357_v47 = vsel %vm1305_vm7, 0, %v338_v53 }
  0x6e   : > { %v398_v12 = vpop.permute.xlu2 %397 }
  0x6f   : > { %v442_v42 = vsel %vm433_vm8, %v352_v41, %v398_v12 }
  0x76   : > { %v400_v32 = vpop.permute.xlu2 %399 }
  0x77   : > { %v445_v28 = vsel %vm433_vm8, %v353_v24, %v400_v32 }
  0x7e   : > { %v402_v13 = vpop.permute.xlu2 %401 }
  0x7f   : > { %v448_v21 = vsel %vm433_vm8, %v354_v45, %v402_v13 }
  0x86   : > { %v394_v20 = vpop.permute.xlu0 %393  ;;  %v428_v59 = vpop.permute.xlu2 %427 }
  0x87   : > { %v436_v5 = vsel %vm433_vm8, %v350_v27, %v394_v20 }
  0x8d   : > { %v418_v10 = vpop.permute.xlu1 %417 }
  0x8e   : > { %v460_v34 = vsel %vm458_vm9, %v436_v5, %v418_v10  ;;  %v396_v37 = vpop.permute.xlu0 %395  ;;  %v408_v49 = vpop.permute.xlu2 %407 }
  0x8f   : > { %485 = vst.msk [vmem:[#allocation2 + $0x4] sm:$0xf] %vm244_vm3, %v460_v34  ;;  %v439_v6 = vsel %vm433_vm8, %v351_v40, %v396_v37  ;;  %v457_v52 = vsel %vm433_vm8, %v357_v47, %v408_v49 }
  0x95   : > { %v420_v11 = vpop.permute.xlu1 %419 }
  0x96   : > { %v463_v33 = vsel %vm458_vm9, %v439_v6, %v420_v11  ;;  %v422_v43 = vpop.permute.xlu0 %421  ;;  %v1023_v12 = vld [vmem:[#allocation2] sm:$0xff] }
  0x97   : > { %486 = vst.msk [vmem:[#allocation2 + $0x8] sm:$0xf] %vm244_vm3, %v463_v33  ;;  %v466_v44 = vsel %vm458_vm9, %v442_v42, %v422_v43 }
  0x98   : > { %487 = vst.msk [vmem:[#allocation2 + $0xc] sm:$0xf] %vm244_vm3, %v466_v44 }
  0x9d   : > { %v424_v46 = vpop.permute.xlu1 %423 }
  0x9e   : > { %v469_v48 = vsel %vm458_vm9, %v445_v28, %v424_v46  ;;  %v426_v50 = vpop.permute.xlu0 %425  ;;  %v1028_v54 = vld [vmem:[#allocation2 + $0x4] sm:$0xff] }
  0x9f   : > { %488 = vst.msk [vmem:[#allocation2 + $0x10] sm:$0xf] %vm244_vm3, %v469_v48  ;;  %v472_v56 = vsel %vm458_vm9, %v448_v21, %v426_v50  ;;  %v1024_v57 = vld [vmem:[#allocation2 + $0x8] sm:$0xff]  ;;  %965 = vmatmul.msk.bf16.vlgmr.msra.gmra.mxu0 %vm539_vm10, %v1028_v54 }
  0xa0   : > { %489 = vst.msk [vmem:[#allocation2 + $0x14] sm:$0xf] %vm244_vm3, %v472_v56  ;;  %990 = vmatmul.msk.bf16.vlgmr.msra.gmra.mxu1 %vm539_vm10, %v1024_v57  ;;  %713 = vmatpush.bf16.msra.mxu0 %v704_v18  ;;  %v1033_v18 = vld [vmem:[#allocation2 + $0x8] sm:$0xff] }
  0xa5   : > { %v404_v31 = vpop.permute.xlu1 %403 }
  0xa6   : > { %v451_v62 = vsel %vm433_vm8, %v355_v61, %v404_v31  ;;  %v406_v63 = vpop.permute.xlu0 %405  ;;  %v1029_v0 = vld [vmem:[#allocation2 + $0xc] sm:$0xff] }
  0xa7   : > { %v475_v1 = vsel %vm458_vm9, %v451_v62, %v428_v59  ;;  %v1034_v55 = vld [vmem:[#allocation2 + $0x10] sm:$0xff]  ;;  %966 = vmatmul.msk.bf16.vlgmr.msra.gmra.mxu3 %vm539_vm10, %v1029_v0  ;;  %v454_v51 = vsel %vm433_vm8, %v356_v2, %v406_v63 }
  0xa8   : > { %490 = vst.msk [vmem:[#allocation2 + $0x18] sm:$0xf] %vm244_vm3, %v475_v1  ;;  %1016 = vmatmul.msk.bf16.vlgmr.msra.gmra.mxu2 %vm539_vm10, %v1034_v55  ;;  %v1025_v15 = vld [vmem:[#allocation2 + $0x10] sm:$0xff] }
  0xad   : > { %v430_v3 = vpop.permute.xlu1 %429 }
  0xae   : > { %v478_v4 = vsel %vm458_vm9, %v454_v51, %v430_v3  ;;  %v432_v8 = vpop.permute.xlu0 %431 }
  0xaf   : > { %491 = vst.msk [vmem:[#allocation2 + $0x1c] sm:$0xf] %vm244_vm3, %v478_v4  ;;  %v481_v14 = vsel %vm458_vm9, %v457_v52, %v432_v8  ;;  %989 = vmatmul.msk.bf16.vlgmr.msrb.gmra.mxu0 %vm539_vm10, %v1023_v12  ;;  %v1030_v16 = vld [vmem:[#allocation2 + $0x14] sm:$0xff] }
  0xb0   : > { %492 = vst.msk [vmem:[#allocation2 + $0x20] sm:$0xf] %vm244_vm3, %v481_v14  ;;  %991 = vmatmul.msk.bf16.gmra.mxu1 %vm539_vm10, %v1025_v15 }
  0xb6   : > { %v1035_v17 = vld [vmem:[#allocation2 + $0x18] sm:$0xff] }
  0xb7   : > { %967 = vmatmul.msk.bf16.gmra.mxu3 %vm539_vm10, %v1030_v16  ;;  %v1026_v20 = vld [vmem:[#allocation2 + $0x18] sm:$0xff]  ;;  %v1036_v23 = vld [vmem:[#allocation2 + $0x20] sm:$0xff] }
  0xb8   : > { %1017 = vmatmul.msk.bf16.gmra.mxu2 %vm539_vm10, %v1035_v17  ;;  %v1031_v25 = vld [vmem:[#allocation2 + $0x1c] sm:$0xff] }
  0xbf   : > { %1015 = vmatmul.msk.bf16.vlgmr.msra.gmra.mxu0 %vm539_vm10, %v1033_v18 }
  0xc0   : > { %992 = vmatmul.msk.bf16.gmra.mxu1 %vm539_vm10, %v1026_v20 }
  0xc7   : > { %968 = vmatmul.msk.bf16.gmra.mxu3 %vm539_vm10, %v1031_v25 }
  0xc8   : > { %1018 = vmatmul.msk.bf16.gmra.mxu2 %vm539_vm10, %v1036_v23 }
 0x11c   : > { %v565_v9 = vpop.f32.mrf.mxu0 }
 0x11d   : > { %v639_v27 = vpop.f32.mrf.mxu1 }
 0x124   : > { %v567_v29 = vpop.f32.mrf.mxu0 }
 0x125   : > { %v641_v32 = vpop.f32.mrf.mxu1 }
 0x12a   : > { %v570_v5 = vpop.f32.mrf.mxu3 }
 0x12b   : > { %v640_v10 = vadd.f32 %v639_v27, %v570_v5  ;;  %v720_v34 = vpop.f32.mrf.mxu2 }
 0x12c   : > { %v634_v36 = vpop.f32.mrf.mxu0 }
 0x12d   : > { %v737_v37 = vadd.f32 %v720_v34, %v640_v10  ;;  %v644_v41 = vpop.f32.mrf.mxu1  ;;  %v635_v35 = vadd.f32 %v634_v36, %v565_v9 }
 0x12f   : > { %v745_v19 = vpack.c.bf16 %v737_v37, %v737_v37  ;;  %v788_v61 = vmul.f32 %v737_v37, %v737_v37  ;;  %v764_v0 = vsel %vm458_vm9, %v737_v37, 0.0 }
 0x131   : > { %754 = vst.msk [vmem:[%s1394_s13 + $0x8] sm:$0xf] %vm751_vm11, %v745_v19  ;;  %v797_v4 = vsel %vm458_vm9, %v788_v61, 0.0 }
 0x132   : > { %v572_v38 = vpop.f32.mrf.mxu3 }
 0x133   : > { %v642_v22 = vadd.f32 %v641_v32, %v572_v38  ;;  %v722_v40 = vpop.f32.mrf.mxu2 }
 0x134   : > { %v636_v6 = vpop.f32.mrf.mxu0 }
 0x135   : > { %v738_v11 = vadd.f32 %v722_v40, %v642_v22  ;;  %v646_v30 = vpop.f32.mrf.mxu1  ;;  %v637_v48 = vadd.f32 %v636_v6, %v567_v29 }
 0x137   : > { %v746_v13 = vpack.c.bf16 %v738_v11, %v738_v11  ;;  %v789_v1 = vmul.f32 %v738_v11, %v738_v11  ;;  %v766_v8 = vsel %vm458_vm9, %v738_v11, 0.0 }
 0x139   : > { %755 = vst.msk [vmem:[%s1394_s13 + $0xc] sm:$0xf] %vm751_vm11, %v746_v13  ;;  %v799_v17 = vsel %vm458_vm9, %v789_v1, 0.0 }
 0x13a   : > { %v575_v42 = vpop.f32.mrf.mxu3 }
 0x13b   : > { %v645_v33 = vadd.f32 %v644_v41, %v575_v42  ;;  %v725_v43 = vpop.f32.mrf.mxu2 }
 0x13c   : > { %v715_v44 = vpop.f32.mrf.mxu0 }
 0x13d   : > { %v739_v45 = vadd.f32 %v725_v43, %v645_v33  ;;  %v735_v24 = vadd.f32 %v715_v44, %v635_v35  ;;  %v649_v31 = vpop.f32.mrf.mxu1 }
 0x13f   : > { %v747_v21 = vpack.c.bf16 %v739_v45, %v739_v45  ;;  %v743_v28 = vpack.c.bf16 %v735_v24, %v735_v24  ;;  %v786_v59 = vmul.f32 %v735_v24, %v735_v24  ;;  %v761_v26 = vsel %vm458_vm9, %v735_v24, 0.0 }
 0x140   : > { %v790_v12 = vmul.f32 %v739_v45, %v739_v45  ;;  %v768_v18 = vsel %vm458_vm9, %v739_v45, 0.0 }
 0x141   : > { %756 = vst.msk [vmem:[%s1394_s13 + $0x10] sm:$0xf] %vm751_vm11, %v747_v21  ;;  %v794_v55 = vsel %vm458_vm9, %v786_v59, 0.0  ;;  %v785_v59 = vld [vmem:[%s1408_s23] sm:$0x1] }
 0x142   : > { %752 = vst.msk [vmem:[%s1394_s13] sm:$0xf] %vm751_vm11, %v743_v28  ;;  %v577_v46 = vpop.f32.mrf.mxu3  ;;  %v801_v27 = vsel %vm458_vm9, %v790_v12, 0.0 }
 0x143   : > { %v647_v50 = vadd.f32 %v646_v30, %v577_v46  ;;  %v727_v54 = vpop.f32.mrf.mxu2 }
 0x144   : > { %v717_v56 = vpop.f32.mrf.mxu0 }
 0x145   : > { %v740_v57 = vadd.f32 %v727_v54, %v647_v50  ;;  %v736_v58 = vadd.f32 %v717_v56, %v637_v48  ;;  %v651_v5 = vpop.f32.mrf.mxu1  ;;  %v760_v56 = vld [vmem:[%s1402_s21] sm:$0x1] }
 0x147   : > { %v748_v39 = vpack.c.bf16 %v740_v57, %v740_v57  ;;  %v744_v60 = vpack.c.bf16 %v736_v58, %v736_v58  ;;  %v762_v53 = vsel %vm458_vm9, %v736_v58, 0.0  ;;  %v787_v62 = vmul.f32 %v736_v58, %v736_v58 }
 0x148   : > { %v763_v63 = vadd.f32 %v762_v53, %v761_v26  ;;  %v791_v20 = vmul.f32 %v740_v57, %v740_v57  ;;  %v770_v29 = vsel %vm458_vm9, %v740_v57, 0.0 }
 0x149   : > { %757 = vst.msk [vmem:[%s1394_s13 + $0x14] sm:$0xf] %vm751_vm11, %v748_v39  ;;  %v795_v2 = vsel %vm458_vm9, %v787_v62, 0.0 }
 0x14a   : > { %753 = vst.msk [vmem:[%s1394_s13 + $0x4] sm:$0xf] %vm751_vm11, %v744_v60  ;;  %v580_v47 = vpop.f32.mrf.mxu3  ;;  %v765_v49 = vadd.f32 %v764_v0, %v763_v63  ;;  %v796_v51 = vadd.f32 %v795_v2, %v794_v55  ;;  %v803_v36 = vsel %vm458_vm9, %v791_v20, 0.0 }
 0x14b   : > { %v650_v52 = vadd.f32 %v649_v31, %v580_v47  ;;  %v730_v3 = vpop.f32.mrf.mxu2 }
 0x14c   : > { %v767_v14 = vadd.f32 %v766_v8, %v765_v49  ;;  %v798_v15 = vadd.f32 %v797_v4, %v796_v51 }
 0x14d   : > { %v741_v16 = vadd.f32 %v730_v3, %v650_v52 }
 0x14e   : > { %v800_v23 = vadd.f32 %v799_v17, %v798_v15  ;;  %v769_v9 = vadd.f32 %v768_v18, %v767_v14 }
 0x14f   : > { %v749_v25 = vpack.c.bf16 %v741_v16, %v741_v16  ;;  %v792_v37 = vmul.f32 %v741_v16, %v741_v16  ;;  %v772_v40 = vsel %vm458_vm9, %v741_v16, 0.0 }
 0x150   : > { %v802_v32 = vadd.f32 %v801_v27, %v800_v23  ;;  %v771_v10 = vadd.f32 %v770_v29, %v769_v9 }
 0x151   : > { %758 = vst.msk [vmem:[%s1394_s13 + $0x18] sm:$0xf] %vm751_vm11, %v749_v25  ;;  %v805_v11 = vsel %vm458_vm9, %v792_v37, 0.0 }
 0x152   : > { %v582_v34 = vpop.f32.mrf.mxu3  ;;  %v804_v22 = vadd.f32 %v803_v36, %v802_v32  ;;  %v773_v6 = vadd.f32 %v772_v40, %v771_v10 }
 0x153   : > { %v652_v19 = vadd.f32 %v651_v5, %v582_v34  ;;  %v732_v38 = vpop.f32.mrf.mxu2 }
 0x154   : > { %v806_v35 = vadd.f32 %v805_v11, %v804_v22 }
 0x155   : > { %v742_v41 = vadd.f32 %v732_v38, %v652_v19 }
 0x157   : > { %v750_v7 = vpack.c.bf16 %v742_v41, %v742_v41  ;;  %v774_v13 = vsel %vm458_vm9, %v742_v41, 0.0  ;;  %v793_v42 = vmul.f32 %v742_v41, %v742_v41 }
 0x158   : > { %v775_v33 = vadd.f32 %v774_v13, %v773_v6 }
 0x159   : > { %759 = vst.msk [vmem:[%s1394_s13 + $0x1c] sm:$0xf] %vm751_vm11, %v750_v7  ;;  %v807_v43 = vsel %vm458_vm9, %v793_v42, 0.0 }
 0x15a   : > { %v776_v44 = vrot.slane %v775_v33, 4  ;;  %v808_v45 = vadd.f32 %v807_v43, %v806_v35 }
 0x15c   : > { %v777_v24 = vadd.f32 %v776_v44, %v775_v33  ;;  %v809_v30 = vrot.slane %v808_v45, 4 }
 0x15e   : > { %v778_v21 = vrot.slane %v777_v24, 2  ;;  %v810_v28 = vadd.f32 %v809_v30, %v808_v45 }
 0x160   : > { %v779_v46 = vadd.f32 %v778_v21, %v777_v24  ;;  %v811_v48 = vrot.slane %v810_v28, 2 }
 0x162   : > { %v780_v50 = vrot.slane %v779_v46, 1  ;;  %v812_v54 = vadd.f32 %v811_v48, %v810_v28 }
 0x164   : > { %v781_v57 = vadd.f32 %v780_v50, %v779_v46  ;;  %v813_v58 = vrot.slane %v812_v54, 1 }
 0x166   : > { %v782_v39 = vadd.f32 %v781_v57, %v760_v56  ;;  %v814_v60 = vadd.f32 %v813_v58, %v812_v54 }
 0x168   : > { %784 = vst.msk [vmem:[%s1402_s21] sm:$0x1] %vm248_vm12, %v782_v39  ;;  %v815_v61 = vadd.f32 %v814_v60, %v785_v59 }
 0x16a   : > { %816 = vst.msk [vmem:[%s1408_s23] sm:$0x1] %vm248_vm12, %v815_v61 }
 0x16b PF: > { %s15_s17 = sadd.s32 1, %s1110_s17   ;;  %s1468_s15 = smov %s1106_s16 }
 0x16c   : > { %p12_p5 = scmp.ge.s32.totalorder %s15_s17, 4   ;;  %s1469_s16 = smov %s1471_s18 }
 0x16e   :  { %14 = sbr.rel (!%p12_p5) target bundleno = 2 (0x2), region = 91 }

// kernel: down_forward.3
= control target key start
LH: loop header
LB: loop body
LE: loop exit
PB: predicated region body
PF: predicated region fallthrough
CT: control target
= control target key end

     0   :  { %s1275_s21 = smov 0   ;;  %s1277_s22 = smov 0   ;;  %s1597_s0 = inlined_call_operand.vmem [shape: bf16[2,64,8], index: 0, kind: input, shape index: {}]   ;;  %s1598_s1 = inlined_call_operand.vmem [shape: f32[1,8], index: 1, kind: input, shape index: {}]   ;;  %s1599_s2 = inlined_call_operand.vmem [shape: f32[1,8], index: 2, kind: input, shape index: {}]   ;;  %s1600_s3 = inlined_call_operand.vmem [shape: bf16[3,24,8], index: 3, kind: input, shape index: {}]   ;;  %s1601_s4 = inlined_call_operand.vmem [shape: bf16[2,64,8], index: 4, kind: output, shape index: {0}]   ;;  %s1602_s5 = inlined_call_operand.vmem [shape: f32[2,1,8], index: 5, kind: output, shape index: {1}]   ;;  %s1603_s6 = inlined_call_operand.vmem [shape: f32[2,1,8], index: 6, kind: output, shape index: {2}]  }
   0x1   :  { %s1279_s23 = smov 0  }
   0x2 LB: > { %s29_s24 = sadd.s32 1, %s1230_s22  ;;  %p1055_p0 = scmp.ge.s32.totalorder %s1234_s23, 1  ;;  %s1234_s23 = sphi %s1279_s23, %s17_s23   ;;  %s1230_s22 = sphi %s1277_s22, %s1609_s22   ;;  %s1226_s21 = sphi %s1275_s21, %s1608_s21  }
   0x3   : > { %p31_p1 = scmp.ge.s32.totalorder %s29_s24, 2  ;;  %p235_p2 = scmp.lt.s32.totalorder %s1234_s23, 3 }
   0x5   : > { %s1611_s24 = smov (%p31_p1, %s29_s24), 0  ;;  %p236_p3 = pnand %p1055_p0, %p235_p2 }
   0x6   : > { %p274_p4 = scmp.lt.s32.totalorder (!%p236_p3), %s1226_s21, 1  ;;  %s1236_s9 = smov (!%p236_p3), 8  }
   0x7   : > { %239 = sbr.rel (%p236_p3) target bundleno = 373 (0x175), region = 36  ;;  %s1237_s10 = smov (!%p236_p3), 16  }
   0xc   : > { %s1613_s21 = smov (!%p274_p4, %s1226_s21), 1  ;;  %v1210_v0 = vld [vmem:[%s1598_s1] ss:$0 sm:$0xff]  ;;  %vm484_vm0 = vcmask 1043456   ;;  %vm485_vm1 = vsmask.f32 3328 }
   0xd   : > { %s1140_s25 = sshll.u32 %s1613_s21, 5  ;;  %v1211_v5 = vld [vmem:[%s1599_s2] ss:$0 sm:$0xff]  ;;  %vm1324_vm2 = vmand %vm484_vm0, %vm485_vm1  ;;  %vm298_vm3 = vcmask 191488   ;;  %vm449_vm4 = vcmask 1040384   ;;  %vm535_vm7 = vcmask 64512   ;;  %s1546_s11 = scalar_lea.vmem %s1603_s6, %s1613_s21 }
   0xe   : > { %s278_s28 = scalar_lea.vmem %s1597_s0, %s1140_s25  ;;  %vm450_vm5 = vsmask.f32 256  ;;  %vm560_vm8 = vcmask 130048   ;;  %vm647_vm9 = vcmask 195584   ;;  %s1532_s30 = scalar_lea.vmem %s1601_s4, %s1140_s25  ;;  %vm868_vm10 = vcmask 60416  }
   0xf   : > { %v1158_v1 = vld [vmem:[%s278_s28] sm:$0xff]   ;;  %v1173_v2 = vld [vmem:[%s278_s28 + $0x8] sm:$0xff]   ;;  %v1174_v3 = vld [vmem:[%s278_s28 + $0x10] sm:$0xff]   ;;  %vm302_vm11 = vcmask 57344  }
  0x10   : > { %v1159_v4 = vunpack.c.l.bf16 %v1158_v1  ;;  %v1160_v6 = vunpack.c.h.bf16 %v1158_v1  ;;  %v1163_v7 = vunpack.c.l.bf16 %v1173_v2  ;;  %v1164_v8 = vunpack.c.h.bf16 %v1173_v2  ;;  %v1175_v27 = vld [vmem:[%s278_s28 + $0x18] sm:$0xff]   ;;  %vm1443_vm6 = vmand %vm449_vm4, %vm450_vm5 }
  0x11   : > { %v1167_v9 = vunpack.c.l.bf16 %v1174_v3  ;;  %v1168_v10 = vunpack.c.h.bf16 %v1174_v3  ;;  %v1171_v33 = vunpack.c.l.bf16 %v1175_v27  ;;  %v1172_v34 = vunpack.c.h.bf16 %v1175_v27 }
  0x12   : > { %v325_v11 = vmul.f32 %v1210_v0, %v1159_v4  ;;  %v326_v12 = vmul.f32 %v1210_v0, %v1160_v6  ;;  %v327_v13 = vmul.f32 %v1210_v0, %v1163_v7  ;;  %v328_v14 = vmul.f32 %v1210_v0, %v1164_v8 }
  0x13   : > { %v329_v15 = vmul.f32 %v1210_v0, %v1167_v9  ;;  %v330_v16 = vmul.f32 %v1210_v0, %v1168_v10  ;;  %v331_v44 = vmul.f32 %v1210_v0, %v1171_v33  ;;  %v332_v45 = vmul.f32 %v1210_v0, %v1172_v34 }
  0x14   : > { %v337_v17 = vadd.f32 %v1211_v5, %v325_v11  ;;  %v338_v18 = vadd.f32 %v1211_v5, %v326_v12  ;;  %v339_v19 = vadd.f32 %v1211_v5, %v327_v13  ;;  %v340_v20 = vadd.f32 %v1211_v5, %v328_v14 }
  0x15   : > { %v341_v21 = vadd.f32 %v1211_v5, %v329_v15  ;;  %v342_v22 = vadd.f32 %v1211_v5, %v330_v16  ;;  %v343_v55 = vadd.f32 %v1211_v5, %v331_v44  ;;  %v344_v56 = vadd.f32 %v1211_v5, %v332_v45  ;;  %v605_v45 = vld [vmem:[%s1600_s3 + $0x8] sm:$0xf] }
  0x16   : > { %v345_v23 = vmax.f32 %v337_v17, 0.0  ;;  %v346_v24 = vmax.f32 %v338_v18, 0.0  ;;  %v347_v25 = vmax.f32 %v339_v19, 0.0  ;;  %v348_v26 = vmax.f32 %v340_v20, 0.0 }
  0x17   : > { %v349_v28 = vmax.f32 %v341_v21, 0.0  ;;  %v350_v32 = vmax.f32 %v342_v22, 0.0  ;;  %v351_v2 = vmax.f32 %v343_v55, 0.0  ;;  %v352_v3 = vmax.f32 %v344_v56, 0.0  ;;  %v1151_v55 = vld [vmem:[%s1600_s3 + $0xc] sm:$0xff]  ;;  %v1146_v56 = vld [vmem:[%s1600_s3] sm:$0xff] }
  0x18   : > { %v353_v29 = vpack.c.bf16 %v345_v23, %v345_v23  ;;  %v354_v30 = vpack.c.bf16 %v346_v24, %v346_v24  ;;  %v355_v31 = vpack.c.bf16 %v347_v25, %v347_v25  ;;  %v356_v38 = vpack.c.bf16 %v348_v26, %v348_v26 }
  0x19   : > { %v357_v39 = vpack.c.bf16 %v349_v28, %v349_v28  ;;  %v358_v43 = vpack.c.bf16 %v350_v32, %v350_v32  ;;  %v359_v9 = vpack.c.bf16 %v351_v2, %v351_v2  ;;  %v360_v10 = vpack.c.bf16 %v352_v3, %v352_v3 }
  0x1a   : > { %v369_v35 = vunpack.c.l.b16 %v353_v29  ;;  %v370_v36 = vunpack.c.l.b16 %v354_v30  ;;  %v371_v37 = vunpack.c.l.b16 %v355_v31  ;;  %v372_v49 = vunpack.c.l.b16 %v356_v38 }
  0x1b   : > { %v373_v51 = vunpack.c.l.b16 %v357_v39  ;;  %v374_v54 = vunpack.c.l.b16 %v358_v43  ;;  %v375_v20 = vunpack.c.l.b16 %v359_v9  ;;  %v376_v22 = vunpack.c.l.b16 %v360_v10  ;;  %v1062_v43 = vld [vmem:[%s1600_s3 + $0x14] sm:$0xf] }
  0x1c   : > { %v1307_v40 = vpack.c.b16 %v369_v35, %v369_v35  ;;  %v1309_v41 = vpack.c.b16 %v370_v36, %v370_v36  ;;  %v1311_v42 = vpack.c.b16 %v371_v37, %v371_v37  ;;  %v1333_v60 = vpack.c.b16 %v372_v49, %v372_v49 }
  0x1d   : > { %v1338_v63 = vpack.c.b16 %v373_v51, %v373_v51  ;;  %v1343_v1 = vpack.c.b16 %v374_v54, %v374_v54  ;;  %v1381_v25 = vpack.c.b16 %v375_v20, %v375_v20  ;;  %v1385_v27 = vpack.c.b16 %v376_v22, %v376_v22 }
  0x1e   : > { %495 = vrot.lane.b32.xlu0 %v1307_v40, %s1236_s9  ;;  %v386_v46 = vshrl.u32 %v1307_v40, 16  ;;  %v389_v47 = vshll.u32 %v1307_v40, 16  ;;  %v396_v48 = vshll.u32 %v1309_v41, 16  ;;  %499 = vrot.lane.b32.xlu2 %v1311_v42, %s1236_s9  ;;  %v403_v50 = vshll.u32 %v1311_v42, 16 }
  0x1f   : > { %v393_v58 = vshrl.u32 %v1309_v41, 16  ;;  %v400_v61 = vshrl.u32 %v1311_v42, 16  ;;  %v410_v5 = vshll.u32 %v1333_v60, 16  ;;  %v417_v7 = vshll.u32 %v1338_v63, 16 }
  0x20   : > { %v460_v52 = vrot.slane %v389_v47, 1  ;;  %v462_v59 = vrot.slane %v396_v48, 1  ;;  %v464_v62 = vrot.slane %v403_v50, 1  ;;  %v424_v8 = vshll.u32 %v1343_v1, 16 }
  0x21   : > { %v407_v12 = vshrl.u32 %v1333_v60, 16  ;;  %v466_v13 = vrot.slane %v410_v5, 1  ;;  %v414_v14 = vshrl.u32 %v1338_v63, 16  ;;  %v468_v16 = vrot.slane %v417_v7, 1 }
  0x22   : > { %v461_v57 = vor.u32 %v460_v52, %v386_v46  ;;  %v463_v4 = vor.u32 %v462_v59, %v393_v58  ;;  %v465_v6 = vor.u32 %v464_v62, %v400_v61  ;;  %v421_v17 = vshrl.u32 %v1343_v1, 16 }
  0x23   : > { %v470_v18 = vrot.slane %v424_v8, 1  ;;  %v467_v19 = vor.u32 %v466_v13, %v407_v12  ;;  %v469_v21 = vor.u32 %v468_v16, %v414_v14  ;;  %v431_v29 = vshll.u32 %v1381_v25, 16 }
  0x24   : > { %v487_v0 = vsel %vm1324_vm2, %v461_v57, 0  ;;  %v488_v11 = vsel %vm1324_vm2, %v463_v4, 0  ;;  %v489_v15 = vsel %vm1324_vm2, %v465_v6, 0  ;;  %v438_v30 = vshll.u32 %v1385_v27, 16  ;;  %v1113_v57 = vld [vmem:[%s1600_s3 + $0x20] sm:$0xf] }
  0x25   : > { %519 = vrot.lane.b32.xlu1 %v487_v0, %s1237_s10  ;;  %v471_v23 = vor.u32 %v470_v18, %v421_v17  ;;  %v490_v24 = vsel %vm1324_vm2, %v467_v19, 0  ;;  %v491_v26 = vsel %vm1324_vm2, %v469_v21, 0  ;;  %v428_v31 = vshrl.u32 %v1381_v25, 16  ;;  %v1156_v4 = vld [vmem:[%s1600_s3 + $0x18] sm:$0xff] }
  0x26   : > { %497 = vrot.lane.b32.xlu0 %v1309_v41, %s1236_s9  ;;  %501 = vrot.lane.b32.xlu2 %v1333_v60, %s1236_s9  ;;  %v472_v32 = vrot.slane %v431_v29, 1  ;;  %v435_v33 = vshrl.u32 %v1385_v27, 16  ;;  %v474_v34 = vrot.slane %v438_v30, 1  ;;  %v1238_v39 = vmov 0  }
  0x27   : > { %v492_v28 = vsel %vm1324_vm2, %v471_v23, 0  ;;  %299 = vst.msk [vmem:[#allocation2] sm:$0xf] %vm298_vm3, %v1238_v39  ;;  %v643_v44 = vunpack.c.l.b16 %v1062_v43  ;;  %v718_v49 = vunpack.c.l.b16 %v605_v45  ;;  %v804_v59 = vunpack.c.l.b16 %v1113_v57 }
  0x28   : > { %v473_v35 = vor.u32 %v472_v32, %v428_v31  ;;  %v475_v36 = vor.u32 %v474_v34, %v435_v33  ;;  %301 = vst.msk [vmem:[#allocation2 + $0x24] sm:$0xf] %vm298_vm3, %v1238_v39  ;;  %v388_v3 = vrot.slane %v386_v46, 7  ;;  %v395_v46 = vrot.slane %v393_v58, 7 }
  0x29   : > { %v645_v51 = vpack.c.b16 %v643_v44, %v643_v44  ;;  %v720_v52 = vpack.c.b16 %v718_v49, %v718_v49  ;;  %v806_v62 = vpack.c.b16 %v804_v59, %v804_v59  ;;  %v402_v13 = vrot.slane %v400_v61, 7 }
  0x2a   : > { %v493_v37 = vsel %vm1324_vm2, %v473_v35, 0  ;;  %v494_v38 = vsel %vm1324_vm2, %v475_v36, 0  ;;  %v391_v9 = vor.u32 %v389_v47, %v388_v3  ;;  %v398_v18 = vor.u32 %v396_v48, %v395_v46 }
  0x2b   : > { %v662_v53 = vsel %vm484_vm0, %v645_v51, 0  ;;  %v735_v54 = vsel %vm484_vm0, %v720_v52, 0  ;;  %v821_v2 = vsel %vm484_vm0, %v806_v62, 0  ;;  %v405_v58 = vor.u32 %v403_v50, %v402_v13 }
  0x2c   : > { %670 = vmatpush.bf16.msra.mxu0 %v662_v53  ;;  %1176 = vmatpush.bf16.msra.mxu3 %v662_v53  ;;  %v416_v20 = vrot.slane %v414_v14, 7  ;;  %v409_v61 = vrot.slane %v407_v12, 7  ;;  %v453_v21 = vsel %vm1443_vm6, 0, %v398_v18  ;;  %v437_v44 = vrot.slane %v435_v33, 7 }
  0x2d   : > { %521 = vrot.lane.b32.xlu1 %v488_v11, %s1237_s10  ;;  %1178 = vmatpush.bf16.msra.mxu1 %v735_v54  ;;  %v452_v11 = vsel %vm1443_vm6, 0, %v391_v9  ;;  %v454_v22 = vsel %vm1443_vm6, 0, %v405_v58 }
  0x2e   : > { %523 = vrot.lane.b32.xlu0 %v489_v15, %s1237_s10  ;;  %503 = vrot.lane.b32.xlu2 %v1338_v63, %s1236_s9  ;;  %v419_v42 = vor.u32 %v417_v7, %v416_v20  ;;  %v412_v14 = vor.u32 %v410_v5, %v409_v61  ;;  %v423_v7 = vrot.slane %v421_v17, 7  ;;  %v430_v17 = vrot.slane %v428_v31, 7 }
  0x2f   : > { %1180 = vmatpush.bf16.msra.mxu2 %v821_v2  ;;  %v440_v31 = vor.u32 %v438_v30, %v437_v44 }
  0x30   : > { %671 = vmatpush.bf16.msra.mxu0 %v1151_v55  ;;  %1177 = vmatpush.bf16.msra.mxu3 %v1151_v55  ;;  %v455_v63 = vsel %vm1443_vm6, 0, %v412_v14  ;;  %v426_v39 = vor.u32 %v424_v8, %v423_v7 }
  0x31   : > { %1179 = vmatpush.bf16.msra.mxu1 %v1146_v56 }
  0x32   : > { %v457_v45 = vsel %vm1443_vm6, 0, %v426_v39 }
  0x33   : > { %1181 = vmatpush.bf16.msra.mxu2 %v1156_v4 }
  0x34   : > { %743 = vmatpush.bf16.msrb.mxu0 %v735_v54 }
  0x35   : > { %525 = vrot.lane.b32.xlu1 %v490_v24, %s1237_s10 }
  0x36   : > { %527 = vrot.lane.b32.xlu0 %v491_v26, %s1237_s10  ;;  %529 = vrot.lane.b32.xlu2 %v492_v28, %s1237_s10  ;;  %v456_v28 = vsel %vm1443_vm6, 0, %v419_v42  ;;  %v1239_v42 = vmov 0.0  }
  0x37   : > { %304 = vst.msk [vmem:[%s1546_s11] sm:$0x1] %vm302_vm11, %v1239_v42 }
  0x38   : > { %744 = vmatpush.bf16.msrb.mxu0 %v1146_v56 }
  0x3d   : > { %505 = vrot.lane.b32.xlu1 %v1343_v1, %s1236_s9  ;;  %v433_v1 = vor.u32 %v431_v29, %v430_v17 }
  0x3e   : > { %507 = vrot.lane.b32.xlu0 %v1381_v25, %s1236_s9  ;;  %509 = vrot.lane.b32.xlu2 %v1385_v27, %s1236_s9  ;;  %v459_v25 = vsel %vm1443_vm6, 0, %v440_v31  ;;  %s1540_s9 = scalar_lea.vmem %s1602_s5, %s1613_s21 }
  0x3f   : > { %v458_v54 = vsel %vm1443_vm6, 0, %v433_v1  ;;  %303 = vst.msk [vmem:[%s1540_s9] sm:$0x1] %vm302_vm11, %v1239_v42 }
  0x45   : > { %531 = vrot.lane.b32.xlu1 %v493_v37, %s1237_s10 }
  0x46   : > { %533 = vrot.lane.b32.xlu0 %v494_v38, %s1237_s10 }
  0x78   : > { %v500_v0 = vpop.permute.xlu2 %499 }
  0x79   : > { %v544_v23 = vsel %vm535_vm7, %v454_v22, %v500_v0 }
  0x80   : > { %v502_v15 = vpop.permute.xlu2 %501 }
  0x81   : > { %v547_v5 = vsel %vm535_vm7, %v455_v63, %v502_v15 }
  0x88   : > { %v504_v50 = vpop.permute.xlu2 %503 }
  0x89   : > { %v550_v60 = vsel %vm535_vm7, %v456_v28, %v504_v50 }
  0x90   : > { %v496_v6 = vpop.permute.xlu0 %495  ;;  %v530_v43 = vpop.permute.xlu2 %529 }
  0x91   : > { %v538_v40 = vsel %vm535_vm7, %v452_v11, %v496_v6 }
  0x97   : > { %v520_v47 = vpop.permute.xlu1 %519 }
  0x98   : > { %v562_v16 = vsel %vm560_vm8, %v538_v40, %v520_v47  ;;  %v498_v19 = vpop.permute.xlu0 %497  ;;  %v510_v27 = vpop.permute.xlu2 %509 }
  0x99   : > { %587 = vst.msk [vmem:[#allocation2 + $0x4] sm:$0xf] %vm298_vm3, %v562_v16  ;;  %v541_v41 = vsel %vm535_vm7, %v453_v21, %v498_v19  ;;  %v559_v30 = vsel %vm535_vm7, %v459_v25, %v510_v27 }
  0x9f   : > { %v522_v48 = vpop.permute.xlu1 %521 }
  0xa0   : > { %v565_v12 = vsel %vm560_vm8, %v541_v41, %v522_v48  ;;  %v524_v24 = vpop.permute.xlu0 %523  ;;  %v1142_v59 = vld [vmem:[#allocation2] sm:$0xff] }
  0xa1   : > { %588 = vst.msk [vmem:[#allocation2 + $0x8] sm:$0xf] %vm298_vm3, %v565_v12  ;;  %v568_v26 = vsel %vm560_vm8, %v544_v23, %v524_v24 }
  0xa2   : > { %589 = vst.msk [vmem:[#allocation2 + $0xc] sm:$0xf] %vm298_vm3, %v568_v26 }
  0xa7   : > { %v526_v32 = vpop.permute.xlu1 %525 }
  0xa8   : > { %v571_v34 = vsel %vm560_vm8, %v547_v5, %v526_v32  ;;  %v528_v35 = vpop.permute.xlu0 %527  ;;  %v1147_v36 = vld [vmem:[#allocation2 + $0x4] sm:$0xff] }
  0xa9   : > { %590 = vst.msk [vmem:[#allocation2 + $0x10] sm:$0xf] %vm298_vm3, %v571_v34  ;;  %v574_v37 = vsel %vm560_vm8, %v550_v60, %v528_v35  ;;  %v1143_v38 = vld [vmem:[#allocation2 + $0x8] sm:$0xff]  ;;  %1083 = vmatmul.msk.bf16.vlgmr.msra.gmra.mxu0 %vm647_vm9, %v1147_v36 }
  0xaa   : > { %591 = vst.msk [vmem:[#allocation2 + $0x14] sm:$0xf] %vm298_vm3, %v574_v37  ;;  %1108 = vmatmul.msk.bf16.vlgmr.msra.gmra.mxu1 %vm647_vm9, %v1143_v38  ;;  %829 = vmatpush.bf16.msra.mxu0 %v821_v2 }
  0xae   : > { %830 = vmatpush.bf16.msra.mxu0 %v1156_v4  ;;  %v1152_v4 = vld [vmem:[#allocation2 + $0x8] sm:$0xff] }
  0xaf   : > { %v506_v8 = vpop.permute.xlu1 %505 }
  0xb0   : > { %v553_v49 = vsel %vm535_vm7, %v457_v45, %v506_v8  ;;  %v508_v51 = vpop.permute.xlu0 %507  ;;  %v1148_v52 = vld [vmem:[#allocation2 + $0xc] sm:$0xff] }
  0xb1   : > { %v577_v33 = vsel %vm560_vm8, %v553_v49, %v530_v43  ;;  %v1153_v53 = vld [vmem:[#allocation2 + $0x10] sm:$0xff]  ;;  %1084 = vmatmul.msk.bf16.vlgmr.msra.gmra.mxu3 %vm647_vm9, %v1148_v52  ;;  %v556_v29 = vsel %vm535_vm7, %v458_v54, %v508_v51 }
  0xb2   : > { %592 = vst.msk [vmem:[#allocation2 + $0x18] sm:$0xf] %vm298_vm3, %v577_v33  ;;  %1135 = vmatmul.msk.bf16.vlgmr.msra.gmra.mxu2 %vm647_vm9, %v1153_v53  ;;  %v1144_v0 = vld [vmem:[#allocation2 + $0x10] sm:$0xff] }
  0xb7   : > { %v532_v55 = vpop.permute.xlu1 %531 }
  0xb8   : > { %v580_v56 = vsel %vm560_vm8, %v556_v29, %v532_v55  ;;  %v534_v57 = vpop.permute.xlu0 %533 }
  0xb9   : > { %593 = vst.msk [vmem:[#allocation2 + $0x1c] sm:$0xf] %vm298_vm3, %v580_v56  ;;  %v583_v62 = vsel %vm560_vm8, %v559_v30, %v534_v57  ;;  %1107 = vmatmul.msk.bf16.vlgmr.msrb.gmra.mxu0 %vm647_vm9, %v1142_v59  ;;  %v1149_v2 = vld [vmem:[#allocation2 + $0x14] sm:$0xff] }
  0xba   : > { %594 = vst.msk [vmem:[#allocation2 + $0x20] sm:$0xf] %vm298_vm3, %v583_v62  ;;  %1109 = vmatmul.msk.bf16.gmra.mxu1 %vm647_vm9, %v1144_v0 }
  0xc0   : > { %v1154_v3 = vld [vmem:[#allocation2 + $0x18] sm:$0xff] }
  0xc1   : > { %1085 = vmatmul.msk.bf16.gmra.mxu3 %vm647_vm9, %v1149_v2  ;;  %v1145_v6 = vld [vmem:[#allocation2 + $0x18] sm:$0xff]  ;;  %v1155_v9 = vld [vmem:[#allocation2 + $0x20] sm:$0xff] }
  0xc2   : > { %1136 = vmatmul.msk.bf16.gmra.mxu2 %vm647_vm9, %v1154_v3  ;;  %v1150_v10 = vld [vmem:[#allocation2 + $0x1c] sm:$0xff] }
  0xc9   : > { %1134 = vmatmul.msk.bf16.vlgmr.msra.gmra.mxu0 %vm647_vm9, %v1152_v4 }
  0xca   : > { %1110 = vmatmul.msk.bf16.gmra.mxu1 %vm647_vm9, %v1145_v6 }
  0xd1   : > { %1086 = vmatmul.msk.bf16.gmra.mxu3 %vm647_vm9, %v1150_v10 }
  0xd2   : > { %1137 = vmatmul.msk.bf16.gmra.mxu2 %vm647_vm9, %v1155_v9 }
 0x126   : > { %v673_v46 = vpop.f32.mrf.mxu0 }
 0x127   : > { %v751_v11 = vpop.f32.mrf.mxu1 }
 0x12e   : > { %v675_v13 = vpop.f32.mrf.mxu0 }
 0x12f   : > { %v753_v15 = vpop.f32.mrf.mxu1 }
 0x134   : > { %v678_v40 = vpop.f32.mrf.mxu3 }
 0x135   : > { %v752_v47 = vadd.f32 %v751_v11, %v678_v40  ;;  %v837_v16 = vpop.f32.mrf.mxu2 }
 0x136   : > { %v746_v18 = vpop.f32.mrf.mxu0 }
 0x137   : > { %v854_v19 = vadd.f32 %v837_v16, %v752_v47  ;;  %v756_v22 = vpop.f32.mrf.mxu1  ;;  %v747_v14 = vadd.f32 %v746_v18, %v673_v46 }
 0x139   : > { %v862_v58 = vpack.c.bf16 %v854_v19, %v854_v19  ;;  %v905_v45 = vmul.f32 %v854_v19, %v854_v19  ;;  %v881_v52 = vsel %vm535_vm7, %v854_v19, 0.0 }
 0x13b   : > { %871 = vst.msk [vmem:[%s1532_s30 + $0x8] sm:$0xf] %vm868_vm10, %v862_v58  ;;  %v914_v56 = vsel %vm535_vm7, %v905_v45, 0.0 }
 0x13c   : > { %v680_v20 = vpop.f32.mrf.mxu3 }
 0x13d   : > { %v754_v61 = vadd.f32 %v753_v15, %v680_v20  ;;  %v839_v21 = vpop.f32.mrf.mxu2 }
 0x13e   : > { %v748_v41 = vpop.f32.mrf.mxu0 }
 0x13f   : > { %v855_v48 = vadd.f32 %v839_v21, %v754_v61  ;;  %v758_v7 = vpop.f32.mrf.mxu1  ;;  %v749_v34 = vadd.f32 %v748_v41, %v675_v13 }
 0x141   : > { %v863_v50 = vpack.c.bf16 %v855_v48, %v855_v48  ;;  %v906_v33 = vmul.f32 %v855_v48, %v855_v48  ;;  %v883_v57 = vsel %vm535_vm7, %v855_v48, 0.0 }
 0x143   : > { %872 = vst.msk [vmem:[%s1532_s30 + $0xc] sm:$0xf] %vm868_vm10, %v863_v50  ;;  %v916_v3 = vsel %vm535_vm7, %v906_v33, 0.0 }
 0x144   : > { %v683_v23 = vpop.f32.mrf.mxu3 }
 0x145   : > { %v757_v12 = vadd.f32 %v756_v22, %v683_v23  ;;  %v842_v24 = vpop.f32.mrf.mxu2 }
 0x146   : > { %v832_v26 = vpop.f32.mrf.mxu0 }
 0x147   : > { %v856_v28 = vadd.f32 %v842_v24, %v757_v12  ;;  %v852_v63 = vadd.f32 %v832_v26, %v747_v14  ;;  %v761_v8 = vpop.f32.mrf.mxu1 }
 0x149   : > { %v864_v60 = vpack.c.bf16 %v856_v28, %v856_v28  ;;  %v860_v5 = vpack.c.bf16 %v852_v63, %v852_v63  ;;  %v903_v43 = vmul.f32 %v852_v63, %v852_v63  ;;  %v878_v1 = vsel %vm535_vm7, %v852_v63, 0.0 }
 0x14a   : > { %v907_v59 = vmul.f32 %v856_v28, %v856_v28  ;;  %v885_v4 = vsel %vm535_vm7, %v856_v28, 0.0 }
 0x14b   : > { %873 = vst.msk [vmem:[%s1532_s30 + $0x10] sm:$0xf] %vm868_vm10, %v864_v60  ;;  %v911_v53 = vsel %vm535_vm7, %v903_v43, 0.0  ;;  %v902_v43 = vld [vmem:[%s1546_s11] sm:$0x1] }
 0x14c   : > { %869 = vst.msk [vmem:[%s1532_s30] sm:$0xf] %vm868_vm10, %v860_v5  ;;  %v685_v32 = vpop.f32.mrf.mxu3  ;;  %v918_v11 = vsel %vm535_vm7, %v907_v59, 0.0 }
 0x14d   : > { %v759_v35 = vadd.f32 %v758_v7, %v685_v32  ;;  %v844_v36 = vpop.f32.mrf.mxu2 }
 0x14e   : > { %v834_v37 = vpop.f32.mrf.mxu0 }
 0x14f   : > { %v857_v38 = vadd.f32 %v844_v36, %v759_v35  ;;  %v853_v39 = vadd.f32 %v834_v37, %v749_v34  ;;  %v763_v40 = vpop.f32.mrf.mxu1  ;;  %v877_v37 = vld [vmem:[%s1540_s9] sm:$0x1] }
 0x151   : > { %v865_v17 = vpack.c.bf16 %v857_v38, %v857_v38  ;;  %v861_v44 = vpack.c.bf16 %v853_v39, %v853_v39  ;;  %v879_v31 = vsel %vm535_vm7, %v853_v39, 0.0  ;;  %v904_v49 = vmul.f32 %v853_v39, %v853_v39 }
 0x152   : > { %v880_v51 = vadd.f32 %v879_v31, %v878_v1  ;;  %v908_v6 = vmul.f32 %v857_v38, %v857_v38  ;;  %v887_v13 = vsel %vm535_vm7, %v857_v38, 0.0 }
 0x153   : > { %874 = vst.msk [vmem:[%s1532_s30 + $0x14] sm:$0xf] %vm868_vm10, %v865_v17  ;;  %v912_v54 = vsel %vm535_vm7, %v904_v49, 0.0 }
 0x154   : > { %870 = vst.msk [vmem:[%s1532_s30 + $0x4] sm:$0xf] %vm868_vm10, %v861_v44  ;;  %v688_v25 = vpop.f32.mrf.mxu3  ;;  %v882_v27 = vadd.f32 %v881_v52, %v880_v51  ;;  %v913_v29 = vadd.f32 %v912_v54, %v911_v53  ;;  %v920_v18 = vsel %vm535_vm7, %v908_v6, 0.0 }
 0x155   : > { %v762_v30 = vadd.f32 %v761_v8, %v688_v25  ;;  %v847_v55 = vpop.f32.mrf.mxu2 }
 0x156   : > { %v884_v62 = vadd.f32 %v883_v57, %v882_v27  ;;  %v915_v0 = vadd.f32 %v914_v56, %v913_v29 }
 0x157   : > { %v858_v2 = vadd.f32 %v847_v55, %v762_v30 }
 0x158   : > { %v917_v9 = vadd.f32 %v916_v3, %v915_v0  ;;  %v886_v46 = vadd.f32 %v885_v4, %v884_v62 }
 0x159   : > { %v866_v10 = vpack.c.bf16 %v858_v2, %v858_v2  ;;  %v909_v19 = vmul.f32 %v858_v2, %v858_v2  ;;  %v889_v21 = vsel %vm535_vm7, %v858_v2, 0.0 }
 0x15a   : > { %v919_v15 = vadd.f32 %v918_v11, %v917_v9  ;;  %v888_v47 = vadd.f32 %v887_v13, %v886_v46 }
 0x15b   : > { %875 = vst.msk [vmem:[%s1532_s30 + $0x18] sm:$0xf] %vm868_vm10, %v866_v10  ;;  %v922_v48 = vsel %vm535_vm7, %v909_v19, 0.0 }
 0x15c   : > { %v690_v16 = vpop.f32.mrf.mxu3  ;;  %v921_v61 = vadd.f32 %v920_v18, %v919_v15  ;;  %v890_v41 = vadd.f32 %v889_v21, %v888_v47 }
 0x15d   : > { %v764_v58 = vadd.f32 %v763_v40, %v690_v16  ;;  %v849_v20 = vpop.f32.mrf.mxu2 }
 0x15e   : > { %v923_v14 = vadd.f32 %v922_v48, %v921_v61 }
 0x15f   : > { %v859_v22 = vadd.f32 %v849_v20, %v764_v58 }
 0x161   : > { %v867_v42 = vpack.c.bf16 %v859_v22, %v859_v22  ;;  %v891_v50 = vsel %vm535_vm7, %v859_v22, 0.0  ;;  %v910_v23 = vmul.f32 %v859_v22, %v859_v22 }
 0x162   : > { %v892_v12 = vadd.f32 %v891_v50, %v890_v41 }
 0x163   : > { %876 = vst.msk [vmem:[%s1532_s30 + $0x1c] sm:$0xf] %vm868_vm10, %v867_v42  ;;  %v924_v24 = vsel %vm535_vm7, %v910_v23, 0.0 }
 0x164   : > { %v893_v26 = vrot.slane %v892_v12, 4  ;;  %v925_v28 = vadd.f32 %v924_v24, %v923_v14 }
 0x166   : > { %v894_v63 = vadd.f32 %v893_v26, %v892_v12  ;;  %v926_v7 = vrot.slane %v925_v28, 4 }
 0x168   : > { %v895_v60 = vrot.slane %v894_v63, 2  ;;  %v927_v5 = vadd.f32 %v926_v7, %v925_v28 }
 0x16a   : > { %v896_v32 = vadd.f32 %v895_v60, %v894_v63  ;;  %v928_v34 = vrot.slane %v927_v5, 2 }
 0x16c   : > { %v897_v35 = vrot.slane %v896_v32, 1  ;;  %v929_v36 = vadd.f32 %v928_v34, %v927_v5 }
 0x16e   : > { %v898_v38 = vadd.f32 %v897_v35, %v896_v32  ;;  %v930_v39 = vrot.slane %v929_v36, 1 }
 0x170   : > { %v899_v17 = vadd.f32 %v898_v38, %v877_v37  ;;  %v931_v44 = vadd.f32 %v930_v39, %v929_v36 }
 0x172   : > { %901 = vst.msk [vmem:[%s1540_s9] sm:$0x1] %vm302_vm11, %v899_v17  ;;  %v932_v45 = vadd.f32 %v931_v44, %v902_v43 }
 0x174   : > { %933 = vst.msk [vmem:[%s1546_s11] sm:$0x1] %vm302_vm11, %v932_v45 }
 0x175 PF: > { %s17_s23 = sadd.s32 1, %s1234_s23   ;;  %s1608_s21 = smov %s1230_s22 }
 0x176   : > { %p14_p5 = scmp.ge.s32.totalorder %s17_s23, 4   ;;  %s1609_s22 = smov %s1611_s24 }
 0x178   :  { %16 = sbr.rel (!%p14_p5) target bundleno = 2 (0x2), region = 99 }

</bundles_post_ra>
